<compile_context>
chip_gen: v7x
topology: tpu7x:2x2x1
jax: 0.10.0
libtpu: 0.0.40
codegen_flags: <defaults>
</compile_context>

<pallas_src>
import functools
from math import sqrt

import jax
import jax.numpy as jnp
from jax import lax
from jax.experimental import pallas as pl
from jax.experimental.pallas import tpu as pltpu


def _round_up(x, m):
    return ((x + m - 1) // m) * m


def _attentive_transformer_kernel(feat_ref, wt_ref, gamma_ref, beta_ref,
                                  priors_ref, out_ref, *, eps, vbs,
                                  chunks_per_step, d_valid, n_bisect):
    # feat_ref   : (rows, d_in_pad)  bf16   rows = chunks_per_step * vbs
    # wt_ref     : (d_in_pad, d_pad) bf16   (same block every grid step)
    # gamma_ref  : (1, d_pad)        f32
    # beta_ref   : (1, d_pad)        f32
    # priors_ref : (rows, d_pad)     f32
    # out_ref    : (rows, d_pad)     f32
    rows = chunks_per_step * vbs
    d_pad = out_ref.shape[-1]

    # ---- Linear (no bias): bf16 operands, f32 MXU accumulation --------------
    x = jnp.dot(feat_ref[...], wt_ref[...],
                preferred_element_type=jnp.float32)            # (rows, d_pad)

    gamma = gamma_ref[...]                                     # (1, d_pad)
    beta = beta_ref[...]

    # ---- Ghost BatchNorm: single-pass stats, folded into scale/shift --------
    if chunks_per_step == 1:
        mean = jnp.mean(x, axis=0, keepdims=True)
        ex2 = jnp.mean(x * x, axis=0, keepdims=True)
        var = jnp.maximum(ex2 - mean * mean, 0.0)
        scale = gamma * lax.rsqrt(var + eps)                   # (1, d_pad)
        shift = beta - mean * scale
        y = x * scale + shift
    else:
        x3 = x.reshape(chunks_per_step, vbs, d_pad)
        mean = jnp.mean(x3, axis=1, keepdims=True)             # (c, 1, d_pad)
        ex2 = jnp.mean(x3 * x3, axis=1, keepdims=True)
        var = jnp.maximum(ex2 - mean * mean, 0.0)
        scale = gamma * lax.rsqrt(var + eps)                   # (c, 1, d_pad)
        shift = beta - mean * scale
        y = (x3 * scale + shift).reshape(rows, d_pad)

    # ---- multiply by priors --------------------------------------------------
    z = y * priors_ref[...]

    # ---- mask padded lanes (large finite negative, never -inf -> no NaNs) ----
    if d_valid < d_pad:
        col = lax.broadcasted_iota(jnp.int32, (rows, d_pad), 1)
        z = jnp.where(col < d_valid, z, -1e30)

    # ---- sparsemax along the lane axis ----------------------------------------
    # tau* solves  f(tau) = sum_i max(z_i - tau, 0) = 1,  f decreasing.
    # Bracket: f(zmax - 1) >= 1 and f(zmax - 1/D) <= 1.  A fully-unrolled
    # bisection narrows tau; the support set at tau_mid then yields the exact
    # closed-form tau = (sum_{support} z - 1) / |support|.
    z_max = jnp.max(z, axis=-1, keepdims=True)
    lo = z_max - 1.0
    hi = z_max - 1.0 / float(d_valid)
    for _ in range(n_bisect):
        tau_c = 0.5 * (lo + hi)
        f = jnp.sum(jnp.maximum(z - tau_c, 0.0), axis=-1, keepdims=True)
        gt = f > 1.0
        lo = jnp.where(gt, tau_c, lo)
        hi = jnp.where(gt, hi, tau_c)
    tau_mid = 0.5 * (lo + hi)

    supp = (z > tau_mid).astype(jnp.float32)
    k_z = jnp.sum(supp, axis=-1, keepdims=True)                # always >= 1
    s_z = jnp.sum(supp * z, axis=-1, keepdims=True)
    tau = (s_z - 1.0) / k_z
    out_ref[...] = jnp.maximum(z - tau, 0.0).astype(out_ref.dtype)


def prepare_params(fc_weight, gamma, beta, *, matmul_dtype=jnp.bfloat16):
    """One-time parameter prep: transpose, lane-pad and cast the fc weight."""
    d_out, d_in = fc_weight.shape
    d_in_pad = _round_up(d_in, 128)
    d_pad = _round_up(d_out, 128)
    w_t = jnp.zeros((d_in_pad, d_pad), matmul_dtype)
    w_t = w_t.at[:d_in, :d_out].set(fc_weight.T.astype(matmul_dtype))
    gamma_p = jnp.ones((1, d_pad), jnp.float32).at[0, :d_out].set(
        gamma.astype(jnp.float32))
    beta_p = jnp.zeros((1, d_pad), jnp.float32).at[0, :d_out].set(
        beta.astype(jnp.float32))
    return {"w_t": w_t, "gamma": gamma_p, "beta": beta_p,
            "d_in": d_in, "d_out": d_out}


def attentive_transformer(priors, processed_feat, params, *,
                          virtual_batch_size=128, eps=1e-5, n_bisect=25):
    """priors: [B, D_out], processed_feat: [B, D_in], params: prepare_params()."""
    B, d_in = processed_feat.shape
    d_out = params["d_out"]
    assert d_in == params["d_in"]
    assert priors.shape == (B, d_out)

    w_t = params["w_t"]
    d_in_pad, d_pad = w_t.shape
    matmul_dtype = w_t.dtype

    n_chunks = max(B // virtual_batch_size, 1)
    assert B % n_chunks == 0, "batch must split evenly into ghost batches"
    vbs = B // n_chunks

    # Ghost batches per grid step: bigger M per MXU pass and fewer per-step
    # overheads, but keep >= 2 grid steps when possible (v7x has 2 TCs).
    cps = 1
    if vbs % 8 == 0:
        cps = max(1, min(n_chunks, max(512 // vbs, 1)))
        while cps > 1 and n_chunks // cps < 2:
            cps -= 1
        while n_chunks % cps != 0:
            cps -= 1
    rows_per_step = cps * vbs
    n_steps = n_chunks // cps
    if n_steps > 1 and rows_per_step % 8 != 0:
        # sublane-alignment fallback: one grid step covering the whole batch
        cps, n_steps, rows_per_step = n_chunks, 1, B

    # Lane-pad activations.  Padded K columns are zero (no matmul contribution);
    # padded output columns are masked inside the kernel and sliced off below.
    feat_p = jnp.zeros((B, d_in_pad), matmul_dtype).at[:, :d_in].set(
        processed_feat.astype(matmul_dtype))
    priors_p = jnp.zeros((B, d_pad), jnp.float32).at[:, :d_out].set(
        priors.astype(jnp.float32))

    kernel = functools.partial(
        _attentive_transformer_kernel, eps=eps, vbs=vbs,
        chunks_per_step=cps, d_valid=d_out, n_bisect=n_bisect)

    out_p = pl.pallas_call(
        kernel,
        out_shape=jax.ShapeDtypeStruct((B, d_pad), jnp.float32),
        grid_spec=pltpu.PrefetchScalarGridSpec(
            num_scalar_prefetch=0,
            grid=(n_steps,),
            in_specs=[
                pl.BlockSpec((rows_per_step, d_in_pad), lambda s: (s, 0)),  # feat
                pl.BlockSpec((d_in_pad, d_pad), lambda s: (0, 0)),          # W^T
                pl.BlockSpec((1, d_pad), lambda s: (0, 0)),                 # gamma
                pl.BlockSpec((1, d_pad), lambda s: (0, 0)),                 # beta
                pl.BlockSpec((rows_per_step, d_pad), lambda s: (s, 0)),     # priors
            ],
            out_specs=pl.BlockSpec((rows_per_step, d_pad), lambda s: (s, 0)),
        ),
        compiler_params=pltpu.CompilerParams(
            dimension_semantics=("parallel",)),
    )(feat_p, w_t, params["gamma"], params["beta"], priors_p)

    return out_p[:, :d_out]


# ------------------------- pure-JAX reference -------------------------------
def _sparsemax_ref(z):
    d = z.shape[-1]
    z_sorted = jnp.flip(jnp.sort(z, axis=-1), axis=-1)
    cumsum = jnp.cumsum(z_sorted, axis=-1)
    ks = jnp.arange(1, d + 1, dtype=z.dtype)
    cond = 1.0 + ks * z_sorted > cumsum
    k_z = jnp.sum(cond.astype(jnp.int32), axis=-1, keepdims=True)
    tau = (jnp.take_along_axis(cumsum, k_z - 1, axis=-1) - 1.0) / k_z.astype(z.dtype)
    return jnp.maximum(z - tau, 0.0)


def _reference(priors, feat, w, gamma, beta, *, virtual_batch_size, eps=1e-5,
               matmul_dtype=jnp.float32):
    B = feat.shape[0]
    n_chunks = max(B // virtual_batch_size, 1)
    x = jnp.dot(feat.astype(matmul_dtype), w.T.astype(matmul_dtype),
                preferred_element_type=jnp.float32)
    outs = []
    for xc, pc in zip(jnp.split(x, n_chunks, axis=0),
                      jnp.split(priors, n_chunks, axis=0)):
        m = jnp.mean(xc, axis=0, keepdims=True)
        v = jnp.mean((xc - m) ** 2, axis=0, keepdims=True)
        y = (xc - m) / jnp.sqrt(v + eps) * gamma + beta
        outs.append(_sparsemax_ref(y * pc))
    return jnp.concatenate(outs, axis=0)


# --------------------------------- demo --------------------------------------
if __name__ == "__main__":
    B, D_IN, D_OUT = 32, 48, 32
    VBS = 8  # ghost batch size -> 4 chunks, 2 per grid step, 2 grid steps

    key = jax.random.PRNGKey(0)
    k_feat, k_pri, k_w = jax.random.split(key, 3)

    processed_feat = jax.random.normal(k_feat, (B, D_IN), dtype=jnp.float32)
    priors = jax.random.uniform(k_pri, (B, D_OUT), dtype=jnp.float32,
                                minval=0.5, maxval=1.0)

    # fc weight: xavier_normal_ with TabNet's non-GLU gain
    gain = sqrt((D_IN + D_OUT) / sqrt(4 * D_IN))
    xavier_std = gain * sqrt(2.0 / (D_IN + D_OUT))
    fc_weight = xavier_std * jax.random.normal(k_w, (D_OUT, D_IN), dtype=jnp.float32)

    # BatchNorm1d affine params (PyTorch default init)
    gamma = jnp.ones((D_OUT,), dtype=jnp.float32)
    beta = jnp.zeros((D_OUT,), dtype=jnp.float32)

    params = prepare_params(fc_weight, gamma, beta)   # one-time param prep

    out = attentive_transformer(priors, processed_feat, params,
                                virtual_batch_size=VBS)
    out = jax.block_until_ready(out)

    assert out.shape == (B, D_OUT)
    # sparsemax rows sum to 1
    assert bool(jnp.allclose(jnp.sum(out, axis=-1), 1.0, atol=1e-3))

    # tight check vs a reference using the same bf16 matmul operands
    ref_bf16 = _reference(priors, processed_feat, fc_weight, gamma, beta,
                          virtual_batch_size=VBS, matmul_dtype=jnp.bfloat16)
    assert bool(jnp.allclose(out, ref_bf16, atol=1e-4, rtol=1e-3))

    # loose sanity check vs the full-f32 PyTorch-equivalent math
    ref_f32 = _reference(priors, processed_feat, fc_weight, gamma, beta,
                         virtual_batch_size=VBS, matmul_dtype=jnp.float32)
    assert bool(jnp.allclose(out, ref_f32, atol=1e-1))

    print("KERNEL_OK")
</pallas_src>

<mosaic_0001>
module attributes {stable_mosaic.version = 11 : i64} {
  func.func @_attentive_transformer_kernel(%arg0: i32, %arg1: memref<16x128xbf16, #tpu.memory_space<vmem>>, %arg2: memref<128x128xbf16, #tpu.memory_space<vmem>>, %arg3: memref<1x128xf32, #tpu.memory_space<vmem>>, %arg4: memref<1x128xf32, #tpu.memory_space<vmem>>, %arg5: memref<16x128xf32, #tpu.memory_space<vmem>>, %arg6: memref<16x128xf32, #tpu.memory_space<vmem>>) attributes {dimension_semantics = [#tpu.dimension_semantics<parallel>], iteration_bounds = array<i64: 2>, scalar_prefetch = 0 : i64, scratch_operands = 0 : i64, tpu.core_type = #tpu.core_type<tc>, window_params = [{transform_indices = @transform_0, window_bounds = array<i64: 16, 128>}, {pipeline_mode = #tpu.pipeline_mode<synchronous>, transform_indices = @transform_1, window_bounds = array<i64: 128, 128>}, {pipeline_mode = #tpu.pipeline_mode<synchronous>, transform_indices = @transform_2, window_bounds = array<i64: 1, 128>}, {pipeline_mode = #tpu.pipeline_mode<synchronous>, transform_indices = @transform_3, window_bounds = array<i64: 1, 128>}, {transform_indices = @transform_4, window_bounds = array<i64: 16, 128>}, {transform_indices = @transform_5, window_bounds = array<i64: 16, 128>}]} {
    %c0 = arith.constant 0 : index
    %c0_0 = arith.constant 0 : index
    %0 = vector.load %arg1[%c0, %c0_0] : memref<16x128xbf16, #tpu.memory_space<vmem>>, vector<16x128xbf16>
    %c0_1 = arith.constant 0 : index
    %c0_2 = arith.constant 0 : index
    %1 = vector.load %arg2[%c0_1, %c0_2] : memref<128x128xbf16, #tpu.memory_space<vmem>>, vector<128x128xbf16>
    %cst = arith.constant dense<0.000000e+00> : vector<16x128xf32>
    %2 = tpu.matmul %0, %1, %cst {dimension_numbers = #tpu.dot_dimension_numbers<[1], [0], [0], [1], [0, 0, 1, 1], [], []>} : vector<16x128xbf16>, vector<128x128xbf16>, vector<16x128xf32> -> vector<16x128xf32>
    %c0_3 = arith.constant 0 : index
    %c0_4 = arith.constant 0 : index
    %3 = vector.load %arg3[%c0_3, %c0_4] : memref<1x128xf32, #tpu.memory_space<vmem>>, vector<1x128xf32>
    %c0_5 = arith.constant 0 : index
    %c0_6 = arith.constant 0 : index
    %4 = vector.load %arg4[%c0_5, %c0_6] : memref<1x128xf32, #tpu.memory_space<vmem>>, vector<1x128xf32>
    %5 = vector.shape_cast %2 : vector<16x128xf32> to vector<2x8x128xf32>
    %cst_7 = arith.constant dense<0.000000e+00> : vector<2x128xf32>
    %6 = vector.multi_reduction <add>, %5, %cst_7 [1] : vector<2x8x128xf32> to vector<2x128xf32>
    %7 = vector.shape_cast %6 : vector<2x128xf32> to vector<2x1x128xf32>
    %cst_8 = arith.constant 8.000000e+00 : f32
    %8 = vector.broadcast %cst_8 : f32 to vector<2x1x128xf32>
    %9 = arith.divf %7, %8 : vector<2x1x128xf32>
    %10 = arith.mulf %5, %5 : vector<2x8x128xf32>
    %cst_9 = arith.constant dense<0.000000e+00> : vector<2x128xf32>
    %11 = vector.multi_reduction <add>, %10, %cst_9 [1] : vector<2x8x128xf32> to vector<2x128xf32>
    %12 = vector.shape_cast %11 : vector<2x128xf32> to vector<2x1x128xf32>
    %cst_10 = arith.constant 8.000000e+00 : f32
    %13 = vector.broadcast %cst_10 : f32 to vector<2x1x128xf32>
    %14 = arith.divf %12, %13 : vector<2x1x128xf32>
    %15 = arith.mulf %9, %9 : vector<2x1x128xf32>
    %16 = arith.subf %14, %15 : vector<2x1x128xf32>
    %cst_11 = arith.constant 0.000000e+00 : f32
    %17 = vector.broadcast %cst_11 : f32 to vector<2x1x128xf32>
    %18 = arith.maximumf %16, %17 : vector<2x1x128xf32>
    %cst_12 = arith.constant 9.99999974E-6 : f32
    %19 = vector.broadcast %cst_12 : f32 to vector<2x1x128xf32>
    %20 = arith.addf %18, %19 : vector<2x1x128xf32>
    %21 = math.rsqrt %20 : vector<2x1x128xf32>
    %22 = vector.shape_cast %3 : vector<1x128xf32> to vector<1x1x128xf32>
    %23 = vector.broadcast %22 : vector<1x1x128xf32> to vector<2x1x128xf32>
    %24 = arith.mulf %23, %21 : vector<2x1x128xf32>
    %25 = arith.mulf %9, %24 : vector<2x1x128xf32>
    %26 = vector.shape_cast %4 : vector<1x128xf32> to vector<1x1x128xf32>
    %27 = vector.broadcast %26 : vector<1x1x128xf32> to vector<2x1x128xf32>
    %28 = arith.subf %27, %25 : vector<2x1x128xf32>
    %29 = vector.broadcast %24 : vector<2x1x128xf32> to vector<2x8x128xf32>
    %30 = arith.mulf %5, %29 : vector<2x8x128xf32>
    %31 = vector.broadcast %28 : vector<2x1x128xf32> to vector<2x8x128xf32>
    %32 = arith.addf %30, %31 : vector<2x8x128xf32>
    %33 = vector.shape_cast %32 : vector<2x8x128xf32> to vector<16x128xf32>
    %c0_13 = arith.constant 0 : index
    %c0_14 = arith.constant 0 : index
    %34 = vector.load %arg5[%c0_13, %c0_14] : memref<16x128xf32, #tpu.memory_space<vmem>>, vector<16x128xf32>
    %35 = arith.mulf %33, %34 : vector<16x128xf32>
    %36 = tpu.iota {dimensions = array<i32: 1>} : vector<16x128xi32>
    %c32_i32 = arith.constant 32 : i32
    %37 = vector.broadcast %c32_i32 : i32 to vector<16x128xi32>
    %38 = arith.cmpi slt, %36, %37 : vector<16x128xi32>
    %cst_15 = arith.constant -1.000000e+30 : f32
    %39 = vector.broadcast %cst_15 : f32 to vector<16x128xf32>
    %40 = arith.select %38, %35, %39 : vector<16x128xi1>, vector<16x128xf32>
    %cst_16 = arith.constant dense<0xFF800000> : vector<16xf32>
    %41 = vector.multi_reduction <maximumf>, %40, %cst_16 [1] : vector<16x128xf32> to vector<16xf32>
    %42 = vector.shape_cast %41 : vector<16xf32> to vector<16x1xf32>
    %cst_17 = arith.constant 1.000000e+00 : f32
    %43 = vector.broadcast %cst_17 : f32 to vector<16x1xf32>
    %44 = arith.subf %42, %43 : vector<16x1xf32>
    %cst_18 = arith.constant 3.125000e-02 : f32
    %45 = vector.broadcast %cst_18 : f32 to vector<16x1xf32>
    %46 = arith.subf %42, %45 : vector<16x1xf32>
    %47 = arith.addf %44, %46 : vector<16x1xf32>
    %cst_19 = arith.constant 5.000000e-01 : f32
    %48 = vector.broadcast %cst_19 : f32 to vector<16x1xf32>
    %49 = arith.mulf %48, %47 : vector<16x1xf32>
    %50 = vector.broadcast %49 : vector<16x1xf32> to vector<16x128xf32>
    %51 = arith.subf %40, %50 : vector<16x128xf32>
    %cst_20 = arith.constant 0.000000e+00 : f32
    %52 = vector.broadcast %cst_20 : f32 to vector<16x128xf32>
    %53 = arith.maximumf %51, %52 : vector<16x128xf32>
    %cst_21 = arith.constant dense<0.000000e+00> : vector<16xf32>
    %54 = vector.multi_reduction <add>, %53, %cst_21 [1] : vector<16x128xf32> to vector<16xf32>
    %55 = vector.shape_cast %54 : vector<16xf32> to vector<16x1xf32>
    %cst_22 = arith.constant 1.000000e+00 : f32
    %56 = vector.broadcast %cst_22 : f32 to vector<16x1xf32>
    %57 = arith.cmpf ogt, %55, %56 : vector<16x1xf32>
    %58 = arith.select %57, %49, %44 : vector<16x1xi1>, vector<16x1xf32>
    %59 = arith.select %57, %46, %49 : vector<16x1xi1>, vector<16x1xf32>
    %60 = arith.addf %58, %59 : vector<16x1xf32>
    %cst_23 = arith.constant 5.000000e-01 : f32
    %61 = vector.broadcast %cst_23 : f32 to vector<16x1xf32>
    %62 = arith.mulf %61, %60 : vector<16x1xf32>
    %63 = vector.broadcast %62 : vector<16x1xf32> to vector<16x128xf32>
    %64 = arith.subf %40, %63 : vector<16x128xf32>
    %cst_24 = arith.constant 0.000000e+00 : f32
    %65 = vector.broadcast %cst_24 : f32 to vector<16x128xf32>
    %66 = arith.maximumf %64, %65 : vector<16x128xf32>
    %cst_25 = arith.constant dense<0.000000e+00> : vector<16xf32>
    %67 = vector.multi_reduction <add>, %66, %cst_25 [1] : vector<16x128xf32> to vector<16xf32>
    %68 = vector.shape_cast %67 : vector<16xf32> to vector<16x1xf32>
    %cst_26 = arith.constant 1.000000e+00 : f32
    %69 = vector.broadcast %cst_26 : f32 to vector<16x1xf32>
    %70 = arith.cmpf ogt, %68, %69 : vector<16x1xf32>
    %71 = arith.select %70, %62, %58 : vector<16x1xi1>, vector<16x1xf32>
    %72 = arith.select %70, %59, %62 : vector<16x1xi1>, vector<16x1xf32>
    %73 = arith.addf %71, %72 : vector<16x1xf32>
    %cst_27 = arith.constant 5.000000e-01 : f32
    %74 = vector.broadcast %cst_27 : f32 to vector<16x1xf32>
    %75 = arith.mulf %74, %73 : vector<16x1xf32>
    %76 = vector.broadcast %75 : vector<16x1xf32> to vector<16x128xf32>
    %77 = arith.subf %40, %76 : vector<16x128xf32>
    %cst_28 = arith.constant 0.000000e+00 : f32
    %78 = vector.broadcast %cst_28 : f32 to vector<16x128xf32>
    %79 = arith.maximumf %77, %78 : vector<16x128xf32>
    %cst_29 = arith.constant dense<0.000000e+00> : vector<16xf32>
    %80 = vector.multi_reduction <add>, %79, %cst_29 [1] : vector<16x128xf32> to vector<16xf32>
    %81 = vector.shape_cast %80 : vector<16xf32> to vector<16x1xf32>
    %cst_30 = arith.constant 1.000000e+00 : f32
    %82 = vector.broadcast %cst_30 : f32 to vector<16x1xf32>
    %83 = arith.cmpf ogt, %81, %82 : vector<16x1xf32>
    %84 = arith.select %83, %75, %71 : vector<16x1xi1>, vector<16x1xf32>
    %85 = arith.select %83, %72, %75 : vector<16x1xi1>, vector<16x1xf32>
    %86 = arith.addf %84, %85 : vector<16x1xf32>
    %cst_31 = arith.constant 5.000000e-01 : f32
    %87 = vector.broadcast %cst_31 : f32 to vector<16x1xf32>
    %88 = arith.mulf %87, %86 : vector<16x1xf32>
    %89 = vector.broadcast %88 : vector<16x1xf32> to vector<16x128xf32>
    %90 = arith.subf %40, %89 : vector<16x128xf32>
    %cst_32 = arith.constant 0.000000e+00 : f32
    %91 = vector.broadcast %cst_32 : f32 to vector<16x128xf32>
    %92 = arith.maximumf %90, %91 : vector<16x128xf32>
    %cst_33 = arith.constant dense<0.000000e+00> : vector<16xf32>
    %93 = vector.multi_reduction <add>, %92, %cst_33 [1] : vector<16x128xf32> to vector<16xf32>
    %94 = vector.shape_cast %93 : vector<16xf32> to vector<16x1xf32>
    %cst_34 = arith.constant 1.000000e+00 : f32
    %95 = vector.broadcast %cst_34 : f32 to vector<16x1xf32>
    %96 = arith.cmpf ogt, %94, %95 : vector<16x1xf32>
    %97 = arith.select %96, %88, %84 : vector<16x1xi1>, vector<16x1xf32>
    %98 = arith.select %96, %85, %88 : vector<16x1xi1>, vector<16x1xf32>
    %99 = arith.addf %97, %98 : vector<16x1xf32>
    %cst_35 = arith.constant 5.000000e-01 : f32
    %100 = vector.broadcast %cst_35 : f32 to vector<16x1xf32>
    %101 = arith.mulf %100, %99 : vector<16x1xf32>
    %102 = vector.broadcast %101 : vector<16x1xf32> to vector<16x128xf32>
    %103 = arith.subf %40, %102 : vector<16x128xf32>
    %cst_36 = arith.constant 0.000000e+00 : f32
    %104 = vector.broadcast %cst_36 : f32 to vector<16x128xf32>
    %105 = arith.maximumf %103, %104 : vector<16x128xf32>
    %cst_37 = arith.constant dense<0.000000e+00> : vector<16xf32>
    %106 = vector.multi_reduction <add>, %105, %cst_37 [1] : vector<16x128xf32> to vector<16xf32>
    %107 = vector.shape_cast %106 : vector<16xf32> to vector<16x1xf32>
    %cst_38 = arith.constant 1.000000e+00 : f32
    %108 = vector.broadcast %cst_38 : f32 to vector<16x1xf32>
    %109 = arith.cmpf ogt, %107, %108 : vector<16x1xf32>
    %110 = arith.select %109, %101, %97 : vector<16x1xi1>, vector<16x1xf32>
    %111 = arith.select %109, %98, %101 : vector<16x1xi1>, vector<16x1xf32>
    %112 = arith.addf %110, %111 : vector<16x1xf32>
    %cst_39 = arith.constant 5.000000e-01 : f32
    %113 = vector.broadcast %cst_39 : f32 to vector<16x1xf32>
    %114 = arith.mulf %113, %112 : vector<16x1xf32>
    %115 = vector.broadcast %114 : vector<16x1xf32> to vector<16x128xf32>
    %116 = arith.subf %40, %115 : vector<16x128xf32>
    %cst_40 = arith.constant 0.000000e+00 : f32
    %117 = vector.broadcast %cst_40 : f32 to vector<16x128xf32>
    %118 = arith.maximumf %116, %117 : vector<16x128xf32>
    %cst_41 = arith.constant dense<0.000000e+00> : vector<16xf32>
    %119 = vector.multi_reduction <add>, %118, %cst_41 [1] : vector<16x128xf32> to vector<16xf32>
    %120 = vector.shape_cast %119 : vector<16xf32> to vector<16x1xf32>
    %cst_42 = arith.constant 1.000000e+00 : f32
    %121 = vector.broadcast %cst_42 : f32 to vector<16x1xf32>
    %122 = arith.cmpf ogt, %120, %121 : vector<16x1xf32>
    %123 = arith.select %122, %114, %110 : vector<16x1xi1>, vector<16x1xf32>
    %124 = arith.select %122, %111, %114 : vector<16x1xi1>, vector<16x1xf32>
    %125 = arith.addf %123, %124 : vector<16x1xf32>
    %cst_43 = arith.constant 5.000000e-01 : f32
    %126 = vector.broadcast %cst_43 : f32 to vector<16x1xf32>
    %127 = arith.mulf %126, %125 : vector<16x1xf32>
    %128 = vector.broadcast %127 : vector<16x1xf32> to vector<16x128xf32>
    %129 = arith.subf %40, %128 : vector<16x128xf32>
    %cst_44 = arith.constant 0.000000e+00 : f32
    %130 = vector.broadcast %cst_44 : f32 to vector<16x128xf32>
    %131 = arith.maximumf %129, %130 : vector<16x128xf32>
    %cst_45 = arith.constant dense<0.000000e+00> : vector<16xf32>
    %132 = vector.multi_reduction <add>, %131, %cst_45 [1] : vector<16x128xf32> to vector<16xf32>
    %133 = vector.shape_cast %132 : vector<16xf32> to vector<16x1xf32>
    %cst_46 = arith.constant 1.000000e+00 : f32
    %134 = vector.broadcast %cst_46 : f32 to vector<16x1xf32>
    %135 = arith.cmpf ogt, %133, %134 : vector<16x1xf32>
    %136 = arith.select %135, %127, %123 : vector<16x1xi1>, vector<16x1xf32>
    %137 = arith.select %135, %124, %127 : vector<16x1xi1>, vector<16x1xf32>
    %138 = arith.addf %136, %137 : vector<16x1xf32>
    %cst_47 = arith.constant 5.000000e-01 : f32
    %139 = vector.broadcast %cst_47 : f32 to vector<16x1xf32>
    %140 = arith.mulf %139, %138 : vector<16x1xf32>
    %141 = vector.broadcast %140 : vector<16x1xf32> to vector<16x128xf32>
    %142 = arith.subf %40, %141 : vector<16x128xf32>
    %cst_48 = arith.constant 0.000000e+00 : f32
    %143 = vector.broadcast %cst_48 : f32 to vector<16x128xf32>
    %144 = arith.maximumf %142, %143 : vector<16x128xf32>
    %cst_49 = arith.constant dense<0.000000e+00> : vector<16xf32>
    %145 = vector.multi_reduction <add>, %144, %cst_49 [1] : vector<16x128xf32> to vector<16xf32>
    %146 = vector.shape_cast %145 : vector<16xf32> to vector<16x1xf32>
    %cst_50 = arith.constant 1.000000e+00 : f32
    %147 = vector.broadcast %cst_50 : f32 to vector<16x1xf32>
    %148 = arith.cmpf ogt, %146, %147 : vector<16x1xf32>
    %149 = arith.select %148, %140, %136 : vector<16x1xi1>, vector<16x1xf32>
    %150 = arith.select %148, %137, %140 : vector<16x1xi1>, vector<16x1xf32>
    %151 = arith.addf %149, %150 : vector<16x1xf32>
    %cst_51 = arith.constant 5.000000e-01 : f32
    %152 = vector.broadcast %cst_51 : f32 to vector<16x1xf32>
    %153 = arith.mulf %152, %151 : vector<16x1xf32>
    %154 = vector.broadcast %153 : vector<16x1xf32> to vector<16x128xf32>
    %155 = arith.subf %40, %154 : vector<16x128xf32>
    %cst_52 = arith.constant 0.000000e+00 : f32
    %156 = vector.broadcast %cst_52 : f32 to vector<16x128xf32>
    %157 = arith.maximumf %155, %156 : vector<16x128xf32>
    %cst_53 = arith.constant dense<0.000000e+00> : vector<16xf32>
    %158 = vector.multi_reduction <add>, %157, %cst_53 [1] : vector<16x128xf32> to vector<16xf32>
    %159 = vector.shape_cast %158 : vector<16xf32> to vector<16x1xf32>
    %cst_54 = arith.constant 1.000000e+00 : f32
    %160 = vector.broadcast %cst_54 : f32 to vector<16x1xf32>
    %161 = arith.cmpf ogt, %159, %160 : vector<16x1xf32>
    %162 = arith.select %161, %153, %149 : vector<16x1xi1>, vector<16x1xf32>
    %163 = arith.select %161, %150, %153 : vector<16x1xi1>, vector<16x1xf32>
    %164 = arith.addf %162, %163 : vector<16x1xf32>
    %cst_55 = arith.constant 5.000000e-01 : f32
    %165 = vector.broadcast %cst_55 : f32 to vector<16x1xf32>
    %166 = arith.mulf %165, %164 : vector<16x1xf32>
    %167 = vector.broadcast %166 : vector<16x1xf32> to vector<16x128xf32>
    %168 = arith.subf %40, %167 : vector<16x128xf32>
    %cst_56 = arith.constant 0.000000e+00 : f32
    %169 = vector.broadcast %cst_56 : f32 to vector<16x128xf32>
    %170 = arith.maximumf %168, %169 : vector<16x128xf32>
    %cst_57 = arith.constant dense<0.000000e+00> : vector<16xf32>
    %171 = vector.multi_reduction <add>, %170, %cst_57 [1] : vector<16x128xf32> to vector<16xf32>
    %172 = vector.shape_cast %171 : vector<16xf32> to vector<16x1xf32>
    %cst_58 = arith.constant 1.000000e+00 : f32
    %173 = vector.broadcast %cst_58 : f32 to vector<16x1xf32>
    %174 = arith.cmpf ogt, %172, %173 : vector<16x1xf32>
    %175 = arith.select %174, %166, %162 : vector<16x1xi1>, vector<16x1xf32>
    %176 = arith.select %174, %163, %166 : vector<16x1xi1>, vector<16x1xf32>
    %177 = arith.addf %175, %176 : vector<16x1xf32>
    %cst_59 = arith.constant 5.000000e-01 : f32
    %178 = vector.broadcast %cst_59 : f32 to vector<16x1xf32>
    %179 = arith.mulf %178, %177 : vector<16x1xf32>
    %180 = vector.broadcast %179 : vector<16x1xf32> to vector<16x128xf32>
    %181 = arith.subf %40, %180 : vector<16x128xf32>
    %cst_60 = arith.constant 0.000000e+00 : f32
    %182 = vector.broadcast %cst_60 : f32 to vector<16x128xf32>
    %183 = arith.maximumf %181, %182 : vector<16x128xf32>
    %cst_61 = arith.constant dense<0.000000e+00> : vector<16xf32>
    %184 = vector.multi_reduction <add>, %183, %cst_61 [1] : vector<16x128xf32> to vector<16xf32>
    %185 = vector.shape_cast %184 : vector<16xf32> to vector<16x1xf32>
    %cst_62 = arith.constant 1.000000e+00 : f32
    %186 = vector.broadcast %cst_62 : f32 to vector<16x1xf32>
    %187 = arith.cmpf ogt, %185, %186 : vector<16x1xf32>
    %188 = arith.select %187, %179, %175 : vector<16x1xi1>, vector<16x1xf32>
    %189 = arith.select %187, %176, %179 : vector<16x1xi1>, vector<16x1xf32>
    %190 = arith.addf %188, %189 : vector<16x1xf32>
    %cst_63 = arith.constant 5.000000e-01 : f32
    %191 = vector.broadcast %cst_63 : f32 to vector<16x1xf32>
    %192 = arith.mulf %191, %190 : vector<16x1xf32>
    %193 = vector.broadcast %192 : vector<16x1xf32> to vector<16x128xf32>
    %194 = arith.subf %40, %193 : vector<16x128xf32>
    %cst_64 = arith.constant 0.000000e+00 : f32
    %195 = vector.broadcast %cst_64 : f32 to vector<16x128xf32>
    %196 = arith.maximumf %194, %195 : vector<16x128xf32>
    %cst_65 = arith.constant dense<0.000000e+00> : vector<16xf32>
    %197 = vector.multi_reduction <add>, %196, %cst_65 [1] : vector<16x128xf32> to vector<16xf32>
    %198 = vector.shape_cast %197 : vector<16xf32> to vector<16x1xf32>
    %cst_66 = arith.constant 1.000000e+00 : f32
    %199 = vector.broadcast %cst_66 : f32 to vector<16x1xf32>
    %200 = arith.cmpf ogt, %198, %199 : vector<16x1xf32>
    %201 = arith.select %200, %192, %188 : vector<16x1xi1>, vector<16x1xf32>
    %202 = arith.select %200, %189, %192 : vector<16x1xi1>, vector<16x1xf32>
    %203 = arith.addf %201, %202 : vector<16x1xf32>
    %cst_67 = arith.constant 5.000000e-01 : f32
    %204 = vector.broadcast %cst_67 : f32 to vector<16x1xf32>
    %205 = arith.mulf %204, %203 : vector<16x1xf32>
    %206 = vector.broadcast %205 : vector<16x1xf32> to vector<16x128xf32>
    %207 = arith.subf %40, %206 : vector<16x128xf32>
    %cst_68 = arith.constant 0.000000e+00 : f32
    %208 = vector.broadcast %cst_68 : f32 to vector<16x128xf32>
    %209 = arith.maximumf %207, %208 : vector<16x128xf32>
    %cst_69 = arith.constant dense<0.000000e+00> : vector<16xf32>
    %210 = vector.multi_reduction <add>, %209, %cst_69 [1] : vector<16x128xf32> to vector<16xf32>
    %211 = vector.shape_cast %210 : vector<16xf32> to vector<16x1xf32>
    %cst_70 = arith.constant 1.000000e+00 : f32
    %212 = vector.broadcast %cst_70 : f32 to vector<16x1xf32>
    %213 = arith.cmpf ogt, %211, %212 : vector<16x1xf32>
    %214 = arith.select %213, %205, %201 : vector<16x1xi1>, vector<16x1xf32>
    %215 = arith.select %213, %202, %205 : vector<16x1xi1>, vector<16x1xf32>
    %216 = arith.addf %214, %215 : vector<16x1xf32>
    %cst_71 = arith.constant 5.000000e-01 : f32
    %217 = vector.broadcast %cst_71 : f32 to vector<16x1xf32>
    %218 = arith.mulf %217, %216 : vector<16x1xf32>
    %219 = vector.broadcast %218 : vector<16x1xf32> to vector<16x128xf32>
    %220 = arith.subf %40, %219 : vector<16x128xf32>
    %cst_72 = arith.constant 0.000000e+00 : f32
    %221 = vector.broadcast %cst_72 : f32 to vector<16x128xf32>
    %222 = arith.maximumf %220, %221 : vector<16x128xf32>
    %cst_73 = arith.constant dense<0.000000e+00> : vector<16xf32>
    %223 = vector.multi_reduction <add>, %222, %cst_73 [1] : vector<16x128xf32> to vector<16xf32>
    %224 = vector.shape_cast %223 : vector<16xf32> to vector<16x1xf32>
    %cst_74 = arith.constant 1.000000e+00 : f32
    %225 = vector.broadcast %cst_74 : f32 to vector<16x1xf32>
    %226 = arith.cmpf ogt, %224, %225 : vector<16x1xf32>
    %227 = arith.select %226, %218, %214 : vector<16x1xi1>, vector<16x1xf32>
    %228 = arith.select %226, %215, %218 : vector<16x1xi1>, vector<16x1xf32>
    %229 = arith.addf %227, %228 : vector<16x1xf32>
    %cst_75 = arith.constant 5.000000e-01 : f32
    %230 = vector.broadcast %cst_75 : f32 to vector<16x1xf32>
    %231 = arith.mulf %230, %229 : vector<16x1xf32>
    %232 = vector.broadcast %231 : vector<16x1xf32> to vector<16x128xf32>
    %233 = arith.subf %40, %232 : vector<16x128xf32>
    %cst_76 = arith.constant 0.000000e+00 : f32
    %234 = vector.broadcast %cst_76 : f32 to vector<16x128xf32>
    %235 = arith.maximumf %233, %234 : vector<16x128xf32>
    %cst_77 = arith.constant dense<0.000000e+00> : vector<16xf32>
    %236 = vector.multi_reduction <add>, %235, %cst_77 [1] : vector<16x128xf32> to vector<16xf32>
    %237 = vector.shape_cast %236 : vector<16xf32> to vector<16x1xf32>
    %cst_78 = arith.constant 1.000000e+00 : f32
    %238 = vector.broadcast %cst_78 : f32 to vector<16x1xf32>
    %239 = arith.cmpf ogt, %237, %238 : vector<16x1xf32>
    %240 = arith.select %239, %231, %227 : vector<16x1xi1>, vector<16x1xf32>
    %241 = arith.select %239, %228, %231 : vector<16x1xi1>, vector<16x1xf32>
    %242 = arith.addf %240, %241 : vector<16x1xf32>
    %cst_79 = arith.constant 5.000000e-01 : f32
    %243 = vector.broadcast %cst_79 : f32 to vector<16x1xf32>
    %244 = arith.mulf %243, %242 : vector<16x1xf32>
    %245 = vector.broadcast %244 : vector<16x1xf32> to vector<16x128xf32>
    %246 = arith.subf %40, %245 : vector<16x128xf32>
    %cst_80 = arith.constant 0.000000e+00 : f32
    %247 = vector.broadcast %cst_80 : f32 to vector<16x128xf32>
    %248 = arith.maximumf %246, %247 : vector<16x128xf32>
    %cst_81 = arith.constant dense<0.000000e+00> : vector<16xf32>
    %249 = vector.multi_reduction <add>, %248, %cst_81 [1] : vector<16x128xf32> to vector<16xf32>
    %250 = vector.shape_cast %249 : vector<16xf32> to vector<16x1xf32>
    %cst_82 = arith.constant 1.000000e+00 : f32
    %251 = vector.broadcast %cst_82 : f32 to vector<16x1xf32>
    %252 = arith.cmpf ogt, %250, %251 : vector<16x1xf32>
    %253 = arith.select %252, %244, %240 : vector<16x1xi1>, vector<16x1xf32>
    %254 = arith.select %252, %241, %244 : vector<16x1xi1>, vector<16x1xf32>
    %255 = arith.addf %253, %254 : vector<16x1xf32>
    %cst_83 = arith.constant 5.000000e-01 : f32
    %256 = vector.broadcast %cst_83 : f32 to vector<16x1xf32>
    %257 = arith.mulf %256, %255 : vector<16x1xf32>
    %258 = vector.broadcast %257 : vector<16x1xf32> to vector<16x128xf32>
    %259 = arith.subf %40, %258 : vector<16x128xf32>
    %cst_84 = arith.constant 0.000000e+00 : f32
    %260 = vector.broadcast %cst_84 : f32 to vector<16x128xf32>
    %261 = arith.maximumf %259, %260 : vector<16x128xf32>
    %cst_85 = arith.constant dense<0.000000e+00> : vector<16xf32>
    %262 = vector.multi_reduction <add>, %261, %cst_85 [1] : vector<16x128xf32> to vector<16xf32>
    %263 = vector.shape_cast %262 : vector<16xf32> to vector<16x1xf32>
    %cst_86 = arith.constant 1.000000e+00 : f32
    %264 = vector.broadcast %cst_86 : f32 to vector<16x1xf32>
    %265 = arith.cmpf ogt, %263, %264 : vector<16x1xf32>
    %266 = arith.select %265, %257, %253 : vector<16x1xi1>, vector<16x1xf32>
    %267 = arith.select %265, %254, %257 : vector<16x1xi1>, vector<16x1xf32>
    %268 = arith.addf %266, %267 : vector<16x1xf32>
    %cst_87 = arith.constant 5.000000e-01 : f32
    %269 = vector.broadcast %cst_87 : f32 to vector<16x1xf32>
    %270 = arith.mulf %269, %268 : vector<16x1xf32>
    %271 = vector.broadcast %270 : vector<16x1xf32> to vector<16x128xf32>
    %272 = arith.subf %40, %271 : vector<16x128xf32>
    %cst_88 = arith.constant 0.000000e+00 : f32
    %273 = vector.broadcast %cst_88 : f32 to vector<16x128xf32>
    %274 = arith.maximumf %272, %273 : vector<16x128xf32>
    %cst_89 = arith.constant dense<0.000000e+00> : vector<16xf32>
    %275 = vector.multi_reduction <add>, %274, %cst_89 [1] : vector<16x128xf32> to vector<16xf32>
    %276 = vector.shape_cast %275 : vector<16xf32> to vector<16x1xf32>
    %cst_90 = arith.constant 1.000000e+00 : f32
    %277 = vector.broadcast %cst_90 : f32 to vector<16x1xf32>
    %278 = arith.cmpf ogt, %276, %277 : vector<16x1xf32>
    %279 = arith.select %278, %270, %266 : vector<16x1xi1>, vector<16x1xf32>
    %280 = arith.select %278, %267, %270 : vector<16x1xi1>, vector<16x1xf32>
    %281 = arith.addf %279, %280 : vector<16x1xf32>
    %cst_91 = arith.constant 5.000000e-01 : f32
    %282 = vector.broadcast %cst_91 : f32 to vector<16x1xf32>
    %283 = arith.mulf %282, %281 : vector<16x1xf32>
    %284 = vector.broadcast %283 : vector<16x1xf32> to vector<16x128xf32>
    %285 = arith.subf %40, %284 : vector<16x128xf32>
    %cst_92 = arith.constant 0.000000e+00 : f32
    %286 = vector.broadcast %cst_92 : f32 to vector<16x128xf32>
    %287 = arith.maximumf %285, %286 : vector<16x128xf32>
    %cst_93 = arith.constant dense<0.000000e+00> : vector<16xf32>
    %288 = vector.multi_reduction <add>, %287, %cst_93 [1] : vector<16x128xf32> to vector<16xf32>
    %289 = vector.shape_cast %288 : vector<16xf32> to vector<16x1xf32>
    %cst_94 = arith.constant 1.000000e+00 : f32
    %290 = vector.broadcast %cst_94 : f32 to vector<16x1xf32>
    %291 = arith.cmpf ogt, %289, %290 : vector<16x1xf32>
    %292 = arith.select %291, %283, %279 : vector<16x1xi1>, vector<16x1xf32>
    %293 = arith.select %291, %280, %283 : vector<16x1xi1>, vector<16x1xf32>
    %294 = arith.addf %292, %293 : vector<16x1xf32>
    %cst_95 = arith.constant 5.000000e-01 : f32
    %295 = vector.broadcast %cst_95 : f32 to vector<16x1xf32>
    %296 = arith.mulf %295, %294 : vector<16x1xf32>
    %297 = vector.broadcast %296 : vector<16x1xf32> to vector<16x128xf32>
    %298 = arith.subf %40, %297 : vector<16x128xf32>
    %cst_96 = arith.constant 0.000000e+00 : f32
    %299 = vector.broadcast %cst_96 : f32 to vector<16x128xf32>
    %300 = arith.maximumf %298, %299 : vector<16x128xf32>
    %cst_97 = arith.constant dense<0.000000e+00> : vector<16xf32>
    %301 = vector.multi_reduction <add>, %300, %cst_97 [1] : vector<16x128xf32> to vector<16xf32>
    %302 = vector.shape_cast %301 : vector<16xf32> to vector<16x1xf32>
    %cst_98 = arith.constant 1.000000e+00 : f32
    %303 = vector.broadcast %cst_98 : f32 to vector<16x1xf32>
    %304 = arith.cmpf ogt, %302, %303 : vector<16x1xf32>
    %305 = arith.select %304, %296, %292 : vector<16x1xi1>, vector<16x1xf32>
    %306 = arith.select %304, %293, %296 : vector<16x1xi1>, vector<16x1xf32>
    %307 = arith.addf %305, %306 : vector<16x1xf32>
    %cst_99 = arith.constant 5.000000e-01 : f32
    %308 = vector.broadcast %cst_99 : f32 to vector<16x1xf32>
    %309 = arith.mulf %308, %307 : vector<16x1xf32>
    %310 = vector.broadcast %309 : vector<16x1xf32> to vector<16x128xf32>
    %311 = arith.subf %40, %310 : vector<16x128xf32>
    %cst_100 = arith.constant 0.000000e+00 : f32
    %312 = vector.broadcast %cst_100 : f32 to vector<16x128xf32>
    %313 = arith.maximumf %311, %312 : vector<16x128xf32>
    %cst_101 = arith.constant dense<0.000000e+00> : vector<16xf32>
    %314 = vector.multi_reduction <add>, %313, %cst_101 [1] : vector<16x128xf32> to vector<16xf32>
    %315 = vector.shape_cast %314 : vector<16xf32> to vector<16x1xf32>
    %cst_102 = arith.constant 1.000000e+00 : f32
    %316 = vector.broadcast %cst_102 : f32 to vector<16x1xf32>
    %317 = arith.cmpf ogt, %315, %316 : vector<16x1xf32>
    %318 = arith.select %317, %309, %305 : vector<16x1xi1>, vector<16x1xf32>
    %319 = arith.select %317, %306, %309 : vector<16x1xi1>, vector<16x1xf32>
    %320 = arith.addf %318, %319 : vector<16x1xf32>
    %cst_103 = arith.constant 5.000000e-01 : f32
    %321 = vector.broadcast %cst_103 : f32 to vector<16x1xf32>
    %322 = arith.mulf %321, %320 : vector<16x1xf32>
    %323 = vector.broadcast %322 : vector<16x1xf32> to vector<16x128xf32>
    %324 = arith.subf %40, %323 : vector<16x128xf32>
    %cst_104 = arith.constant 0.000000e+00 : f32
    %325 = vector.broadcast %cst_104 : f32 to vector<16x128xf32>
    %326 = arith.maximumf %324, %325 : vector<16x128xf32>
    %cst_105 = arith.constant dense<0.000000e+00> : vector<16xf32>
    %327 = vector.multi_reduction <add>, %326, %cst_105 [1] : vector<16x128xf32> to vector<16xf32>
    %328 = vector.shape_cast %327 : vector<16xf32> to vector<16x1xf32>
    %cst_106 = arith.constant 1.000000e+00 : f32
    %329 = vector.broadcast %cst_106 : f32 to vector<16x1xf32>
    %330 = arith.cmpf ogt, %328, %329 : vector<16x1xf32>
    %331 = arith.select %330, %322, %318 : vector<16x1xi1>, vector<16x1xf32>
    %332 = arith.select %330, %319, %322 : vector<16x1xi1>, vector<16x1xf32>
    %333 = arith.addf %331, %332 : vector<16x1xf32>
    %cst_107 = arith.constant 5.000000e-01 : f32
    %334 = vector.broadcast %cst_107 : f32 to vector<16x1xf32>
    %335 = arith.mulf %334, %333 : vector<16x1xf32>
    %336 = vector.broadcast %335 : vector<16x1xf32> to vector<16x128xf32>
    %337 = arith.subf %40, %336 : vector<16x128xf32>
    %cst_108 = arith.constant 0.000000e+00 : f32
    %338 = vector.broadcast %cst_108 : f32 to vector<16x128xf32>
    %339 = arith.maximumf %337, %338 : vector<16x128xf32>
    %cst_109 = arith.constant dense<0.000000e+00> : vector<16xf32>
    %340 = vector.multi_reduction <add>, %339, %cst_109 [1] : vector<16x128xf32> to vector<16xf32>
    %341 = vector.shape_cast %340 : vector<16xf32> to vector<16x1xf32>
    %cst_110 = arith.constant 1.000000e+00 : f32
    %342 = vector.broadcast %cst_110 : f32 to vector<16x1xf32>
    %343 = arith.cmpf ogt, %341, %342 : vector<16x1xf32>
    %344 = arith.select %343, %335, %331 : vector<16x1xi1>, vector<16x1xf32>
    %345 = arith.select %343, %332, %335 : vector<16x1xi1>, vector<16x1xf32>
    %346 = arith.addf %344, %345 : vector<16x1xf32>
    %cst_111 = arith.constant 5.000000e-01 : f32
    %347 = vector.broadcast %cst_111 : f32 to vector<16x1xf32>
    %348 = arith.mulf %347, %346 : vector<16x1xf32>
    %349 = vector.broadcast %348 : vector<16x1xf32> to vector<16x128xf32>
    %350 = arith.subf %40, %349 : vector<16x128xf32>
    %cst_112 = arith.constant 0.000000e+00 : f32
    %351 = vector.broadcast %cst_112 : f32 to vector<16x128xf32>
    %352 = arith.maximumf %350, %351 : vector<16x128xf32>
    %cst_113 = arith.constant dense<0.000000e+00> : vector<16xf32>
    %353 = vector.multi_reduction <add>, %352, %cst_113 [1] : vector<16x128xf32> to vector<16xf32>
    %354 = vector.shape_cast %353 : vector<16xf32> to vector<16x1xf32>
    %cst_114 = arith.constant 1.000000e+00 : f32
    %355 = vector.broadcast %cst_114 : f32 to vector<16x1xf32>
    %356 = arith.cmpf ogt, %354, %355 : vector<16x1xf32>
    %357 = arith.select %356, %348, %344 : vector<16x1xi1>, vector<16x1xf32>
    %358 = arith.select %356, %345, %348 : vector<16x1xi1>, vector<16x1xf32>
    %359 = arith.addf %357, %358 : vector<16x1xf32>
    %cst_115 = arith.constant 5.000000e-01 : f32
    %360 = vector.broadcast %cst_115 : f32 to vector<16x1xf32>
    %361 = arith.mulf %360, %359 : vector<16x1xf32>
    %362 = vector.broadcast %361 : vector<16x1xf32> to vector<16x128xf32>
    %363 = arith.subf %40, %362 : vector<16x128xf32>
    %cst_116 = arith.constant 0.000000e+00 : f32
    %364 = vector.broadcast %cst_116 : f32 to vector<16x128xf32>
    %365 = arith.maximumf %363, %364 : vector<16x128xf32>
    %cst_117 = arith.constant dense<0.000000e+00> : vector<16xf32>
    %366 = vector.multi_reduction <add>, %365, %cst_117 [1] : vector<16x128xf32> to vector<16xf32>
    %367 = vector.shape_cast %366 : vector<16xf32> to vector<16x1xf32>
    %cst_118 = arith.constant 1.000000e+00 : f32
    %368 = vector.broadcast %cst_118 : f32 to vector<16x1xf32>
    %369 = arith.cmpf ogt, %367, %368 : vector<16x1xf32>
    %370 = arith.select %369, %361, %357 : vector<16x1xi1>, vector<16x1xf32>
    %371 = arith.select %369, %358, %361 : vector<16x1xi1>, vector<16x1xf32>
    %372 = arith.addf %370, %371 : vector<16x1xf32>
    %cst_119 = arith.constant 5.000000e-01 : f32
    %373 = vector.broadcast %cst_119 : f32 to vector<16x1xf32>
    %374 = arith.mulf %373, %372 : vector<16x1xf32>
    %375 = vector.broadcast %374 : vector<16x1xf32> to vector<16x128xf32>
    %376 = arith.cmpf ogt, %40, %375 : vector<16x128xf32>
    %377 = arith.extui %376 : vector<16x128xi1> to vector<16x128xi32>
    %378 = arith.sitofp %377 : vector<16x128xi32> to vector<16x128xf32>
    %cst_120 = arith.constant dense<0.000000e+00> : vector<16xf32>
    %379 = vector.multi_reduction <add>, %378, %cst_120 [1] : vector<16x128xf32> to vector<16xf32>
    %380 = vector.shape_cast %379 : vector<16xf32> to vector<16x1xf32>
    %381 = arith.mulf %378, %40 : vector<16x128xf32>
    %cst_121 = arith.constant dense<0.000000e+00> : vector<16xf32>
    %382 = vector.multi_reduction <add>, %381, %cst_121 [1] : vector<16x128xf32> to vector<16xf32>
    %383 = vector.shape_cast %382 : vector<16xf32> to vector<16x1xf32>
    %cst_122 = arith.constant 1.000000e+00 : f32
    %384 = vector.broadcast %cst_122 : f32 to vector<16x1xf32>
    %385 = arith.subf %383, %384 : vector<16x1xf32>
    %386 = arith.divf %385, %380 : vector<16x1xf32>
    %387 = vector.broadcast %386 : vector<16x1xf32> to vector<16x128xf32>
    %388 = arith.subf %40, %387 : vector<16x128xf32>
    %cst_123 = arith.constant 0.000000e+00 : f32
    %389 = vector.broadcast %cst_123 : f32 to vector<16x128xf32>
    %390 = arith.maximumf %388, %389 : vector<16x128xf32>
    %c0_124 = arith.constant 0 : index
    %c0_125 = arith.constant 0 : index
    %391 = vector.load %arg6[%c0_124, %c0_125] : memref<16x128xf32, #tpu.memory_space<vmem>>, vector<16x128xf32>
    tpu.vector_store %arg6[%c0_124, %c0_125], %390 {strides = array<i32>} : memref<16x128xf32, #tpu.memory_space<vmem>>, vector<16x128xf32>,
    return
  }
  func.func @transform_0(%arg0: i32) -> (i32, i32) {
    %c0_i32 = arith.constant 0 : i32
    %c0_i32_0 = arith.constant 0 : i32
    return %arg0, %c0_i32 : i32, i32
  }
  func.func @transform_1(%arg0: i32) -> (i32, i32) {
    %c0_i32 = arith.constant 0 : i32
    %c0_i32_0 = arith.constant 0 : i32
    %c0_i32_1 = arith.constant 0 : i32
    return %c0_i32, %c0_i32_0 : i32, i32
  }
  func.func @transform_2(%arg0: i32) -> (i32, i32) {
    %c0_i32 = arith.constant 0 : i32
    %c0_i32_0 = arith.constant 0 : i32
    %c0_i32_1 = arith.constant 0 : i32
    return %c0_i32, %c0_i32_0 : i32, i32
  }
  func.func @transform_3(%arg0: i32) -> (i32, i32) {
    %c0_i32 = arith.constant 0 : i32
    %c0_i32_0 = arith.constant 0 : i32
    %c0_i32_1 = arith.constant 0 : i32
    return %c0_i32, %c0_i32_0 : i32, i32
  }
  func.func @transform_4(%arg0: i32) -> (i32, i32) {
    %c0_i32 = arith.constant 0 : i32
    %c0_i32_0 = arith.constant 0 : i32
    return %arg0, %c0_i32 : i32, i32
  }
  func.func @transform_5(%arg0: i32) -> (i32, i32) {
    %c0_i32 = arith.constant 0 : i32
    %c0_i32_0 = arith.constant 0 : i32
    return %arg0, %c0_i32 : i32, i32
  }
}

</mosaic_0001>

<bundles_post_ra>
// kernel: tpu_custom_call.1
= control target key start
LH: loop header
LB: loop body
LE: loop exit
PB: predicated region body
PF: predicated region fallthrough
CT: control target
= control target key end

     0   :  { %s1809_s0 = inlined_call_operand.hbm [shape: bf16[32,128], index: 0, kind: input, shape index: {}]   ;;  %s1810_s1 = inlined_call_operand.hbm [shape: bf16[128,128], index: 1, kind: input, shape index: {}]   ;;  %s1811_s2 = inlined_call_operand.vmem [shape: f32[1,128], index: 2, kind: input, shape index: {}]   ;;  %s1812_s3 = inlined_call_operand.vmem [shape: f32[1,128], index: 3, kind: input, shape index: {}]   ;;  %s1813_s4 = inlined_call_operand.hbm [shape: f32[32,128], index: 4, kind: input, shape index: {}]   ;;  %s1814_s5 = inlined_call_operand.hbm [shape: f32[32,128], index: 5, kind: output, shape index: {}]  }
   0x1   :  { %1821 = sst [smem:[#allocation13_spill]] %s1809_s0 }
   0x2   :  { %1822 = sst [smem:[#allocation14_spill]] %s1813_s4 }
   0x3   :  { %10 = vsyncpa [#allocation3], 0 }
   0x4   :  { %12 = vsyncpa [#allocation3 + $0x1], 0 }
   0x5   :  { %13 = vsyncpa [#allocation6], 0 }
   0x6   :  { %14 = vsyncpa [#allocation4], 0 }
   0x7   :  { %16 = vsyncpa [#allocation4 + $0x1], 0  ;;  %s1467_s18 = smov 0   ;;  %s1469_s19 = smov 0  }
   0x8   :  { %s1471_s20 = smov 0   ;;  %s1473_s21 = smov 0  }
   0x9 LB: > { %s1488_s22 = sadd.s32 1, %s1423_s21   ;;  %s29_s23 = sadd.s32 1, %s1419_s20  ;;  %s1423_s21 = sphi %s1473_s21, %s1843_s21   ;;  %s1419_s20 = sphi %s1471_s20, %s1842_s20   ;;  %s1415_s19 = sphi %s1469_s19, %s1841_s19   ;;  %s1411_s18 = sphi %s1467_s18, %s1840_s18  }
   0xa   : > { %s26_s24 = ssub.s32 %s1423_s21, %s1488_s22  ;;  %p36_p0 = scmp.ne.s32.totalorder %s1419_s20, %s1415_s19 }
   0xb   : > { %p27_p1 = scmp.eq.s32.totalorder %s26_s24, 0  ;;  %p37_p2 = scmp.eq.s32.totalorder %s1423_s21, 0 }
   0xc   : > { %p1200_p5 = scmp.lt.s32.totalorder %s1423_s21, 2  ;;  %s200_s26 = sand.u32 1, %s1423_s21  }
   0xd   : > { %s1497_s25 = scalar_select %p27_p1, %s1419_s20, %s29_s23  }
   0xe   : > { %p38_p3 = por %p37_p2, %p36_p0  ;;  %s202_s27 = sand.u32 1, %s1419_s20  }
   0xf   : > { %s1109_s28 = sshll.u32 %s202_s27, 3  ;;  %s1142_s29 = sshll.u32 %s1423_s21, 7 }
  0x10   : > { %s1823_s0 = sld [smem:[#allocation13_spill]]  ;;  %s204_s8 = scalar_lea.vmem [#allocation2], %s1109_s28 }
  0x11   : > { %s211_s9 = sshll.u32 %s204_s8, 4  ;;  %p1512_p6 = pnand %p1200_p5, %p38_p3  ;;  %s1516_s9 = int_to_ptr.vmem [resolvable:$true] %s211_s9 }
  0x12   : > { %s1518_s11 = sshll.u32 %s202_s27, 4  ;;  %s1520_s12 = scalar_lea.sflag [#allocation3], %s200_s26 }
  0x13   : > { %p1263_p8 = pneg %p1512_p6 }
  0x16   : > { %s1510_s7 = scalar_lea.hbm %s1823_s0, %s1142_s29  ;;  %s1266_s16 = scalar_lea.hbm %s1823_s0, 256 }
  0x17   : > { %s1261_s13 = scalar_lea.hbm %s1510_s7, 128  ;;  %p1267_p11 = scmp.lt.u32.totalorder %s1510_s7, %s1823_s0 }
  0x18   : > { %p1262_p7 = scmp.ne.s32.totalorder %s1510_s7, %s1261_s13  ;;  %p1268_p12 = scmp.lt.u32.totalorder %s1266_s16, %s1261_s13 }
  0x19   : > { %p1270_p1 = scmp.lt.u32.totalorder %s1261_s13, %s1510_s7 }
  0x1a   : > { %p1264_p9 = pnand %p1263_p8, %p1262_p7  ;;  %p1269_p13 = por %p1268_p12, %p1267_p11 }
  0x1c   : > { %p1265_p10 = pneg %p1264_p9  ;;  %p1271_p2 = por %p1270_p1, %p1269_p13 }
  0x1e   : > { %p1272_p3 = pnand %p1271_p2, %p1265_p10 }
  0x20   : > { %1275 = shalt.err (!%p1272_p3)
}
  0x21   : > { %s1276_s24 = scalar_lea.vmem %s1516_s9, 128  ;;  %s1425_s26 = smov [#allocation2]  }
  0x22   : > { %p1277_p5 = scmp.ne.s32.totalorder %s1516_s9, %s1276_s24  ;;  %s1281_s27 = sshll.u32 %s1425_s26, 4  ;;  %s1282_s27 = int_to_ptr.vmem [resolvable:$false] %s1281_s27 }
  0x23   : > { %s1283_s28 = scalar_lea.vmem %s1282_s27, 256  ;;  %p1284_p4 = scmp.lt.s32.totalorder %s1516_s9, %s1282_s27 }
  0x24   : > { %p1279_p7 = pnand %p1277_p5, %p1263_p8  ;;  %p1285_p11 = scmp.lt.s32.totalorder %s1283_s28, %s1276_s24 }
  0x26   : > { %p1280_p9 = pneg %p1279_p7  ;;  %p1286_p12 = por %p1285_p11, %p1284_p4 }
  0x28   : > { %p1287_p13 = pnand %p1286_p12, %p1280_p9 }
  0x2a   : > { %1290 = shalt.err (!%p1287_p13)
}
  0x2b   : > { %s1817_s29 = smov 64   ;;  %s1820_s30 = smov 4  }
  0x2c   : > { %1191 = dma.hbm_to_vmem [thread:$0]  (!%p1512_p6), %s1510_s7, 128, %s1516_s9, %s1520_s12, %s1817_s29, %s1817_s29, %s1820_s30  }
  0x2d   : > { %s225_s6 = scalar_lea.vmem [#allocation7], %s1518_s11  ;;  %s1553_s13 = sadd.s32 4294967295, %s1423_s21  }
  0x2e   : > { %s232_s8 = sshll.u32 %s225_s6, 4  ;;  %s1105_s14 = sadd.s32 4294967294, %s1423_s21   ;;  %s1593_s8 = int_to_ptr.vmem [resolvable:$true] %s232_s8 }
  0x2f   : > { %p42_p4 = scmp.ne.s32.totalorder %s1415_s19, %s1411_s18  ;;  %p1815_p10 = scmp.eq.s32.totalorder %s1553_s13, 0 }
  0x30   : > { %p155_p1 = scmp.eq.s32.totalorder %s1553_s13, 1  ;;  %p161_p2 = scmp.eq.s32.totalorder %s1105_s14, 1 }
  0x31   : > { %p1106_p3 = scmp.ge.s32.totalorder %s1423_s21, 1  ;;  %p1563_p5 = por %p1815_p10, %p42_p4 }
  0x32   : > { %p1570_p7 = por %p155_p1, %p36_p0  ;;  %p1574_p9 = por %p161_p2, %p42_p4 }
  0x33   : > { %s1825_s15 = scalar_select %p1563_p5, 1, 0 }
  0x34   : > { %s1826_s7 = scalar_select %p1570_p7, 1, 0 }
  0x35   : > { %s1827_s9 = scalar_select %p1574_p9, 1, 0 }
  0x36   : > { %p168_p11 = scmp.lt.s32.totalorder %s1423_s21, 3  ;;  %s1428_s16 = smov [#allocation5]  }
  0x37   : > { %s180_s17 = sshll.u32 %s1428_s16, 4  ;;  %s1143_s23 = sshll.u32 %s1423_s21, 8  ;;  %s1583_s17 = int_to_ptr.vmem [resolvable:$true] %s180_s17 }
  0x38   : > { %p1579_p12 = pnand %p1106_p3, %p168_p11  ;;  %s1829_s4 = sld [smem:[#allocation14_spill]] }
  0x3a   : > { %s1828_s11 = scalar_select %p1579_p12, 1, 0 }
  0x3b   : > { %p1184_p0 = pneg %p1579_p12 }
  0x3d   : > { %p1597_p13 = pnand %p1184_p0, %p1815_p10 }
  0x3e   : > { %s1591_s27 = scalar_lea.hbm %s1829_s4, %s1143_s23  ;;  %s1296_s23 = scalar_lea.hbm %s1829_s4, 512 }
  0x3f   : > { %s1291_s6 = scalar_lea.hbm %s1591_s27, 256  ;;  %p1297_p3 = scmp.lt.u32.totalorder %s1591_s27, %s1829_s4 }
  0x40   : > { %p1292_p4 = scmp.ne.s32.totalorder %s1591_s27, %s1291_s6  ;;  %p1298_p11 = scmp.lt.u32.totalorder %s1296_s23, %s1291_s6 }
  0x41   : > { %p1300_p0 = scmp.lt.u32.totalorder %s1291_s6, %s1591_s27 }
  0x42   : > { %p1294_p1 = pnand %p1292_p4, %p1263_p8  ;;  %p1299_p9 = por %p1298_p11, %p1297_p3 }
  0x44   : > { %p1295_p2 = pneg %p1294_p1  ;;  %p1301_p10 = por %p1300_p0, %p1299_p9 }
  0x46   : > { %p1302_p7 = pnand %p1301_p10, %p1295_p2 }
  0x48   : > { %1305 = shalt.err (!%p1302_p7)
}
  0x49   : > { %s1306_s29 = scalar_lea.vmem %s1593_s8, 256  ;;  %s1429_s14 = smov [#allocation7]  }
  0x4a   : > { %p1307_p4 = scmp.ne.s32.totalorder %s1593_s8, %s1306_s29  ;;  %s1311_s16 = sshll.u32 %s1429_s14, 4  ;;  %s1312_s16 = int_to_ptr.vmem [resolvable:$false] %s1311_s16 }
  0x4b   : > { %s1313_s24 = scalar_lea.vmem %s1312_s16, 512  ;;  %p1314_p12 = scmp.lt.s32.totalorder %s1593_s8, %s1312_s16 }
  0x4c   : > { %p1309_p1 = pnand %p1307_p4, %p1263_p8  ;;  %p1315_p3 = scmp.lt.s32.totalorder %s1313_s24, %s1306_s29 }
  0x4e   : > { %p1310_p5 = pneg %p1309_p1  ;;  %p1316_p11 = por %p1315_p3, %p1314_p12 }
  0x50   : > { %p1317_p9 = pnand %p1316_p11, %p1310_p5 }
  0x52   : > { %1320 = shalt.err (!%p1317_p9)
}
  0x53   : > { %s1430_s6 = smov 128   ;;  %s1431_s23 = smov 8  }
  0x54   : > { %1194 = dma.hbm_to_vmem [thread:$0]  (!%p1512_p6), %s1591_s27, 256, %s1593_s8, %s1520_s12, %s1430_s6, %s1430_s6, %s1431_s23  }
  0x55   : > { %s1321_s14 = scalar_lea.hbm %s1810_s1, 1024  ;;  %p1323_p10 = pneg %p1597_p13 }
  0x56   : > { %p1322_p8 = scmp.ne.s32.totalorder %s1810_s1, %s1321_s14  ;;  %p1328_p12 = scmp.lt.u32.totalorder %s1321_s14, %s1810_s1 }
  0x58   : > { %p1324_p5 = pnand %p1323_p10, %p1322_p8 }
  0x5a   : > { %p1325_p7 = pneg %p1324_p5 }
  0x5c   : > { %p1330_p2 = pnand %p1328_p12, %p1325_p7 }
  0x5e   : > { %1333 = shalt.err (!%p1330_p2)
}
  0x5f   : > { %s1334_s10 = scalar_lea.vmem %s1583_s17, 1024  ;;  %p1342_p1 = scmp.lt.s32.totalorder %s1583_s17, %s1583_s17 }
  0x60   : > { %p1335_p6 = scmp.ne.s32.totalorder %s1583_s17, %s1334_s10  ;;  %p1343_p3 = scmp.lt.s32.totalorder %s1334_s10, %s1334_s10 }
  0x62   : > { %p1337_p0 = pnand %p1335_p6, %p1323_p10  ;;  %p1344_p11 = por %p1343_p3, %p1342_p1 }
  0x64   : > { %p1338_p4 = pneg %p1337_p0 }
  0x66   : > { %p1345_p9 = pnand %p1344_p11, %p1338_p4 }
  0x68   : > { %1348 = shalt.err (!%p1345_p9)
}
  0x69   : > { %s1831_s0 = smov 4   ;;  %s1832_s4 = smov 64  }
  0x6a   : > { %1187 = dma.hbm_to_vmem [thread:$0]  (!%p1597_p13), %s1810_s1, 1024, %s1583_s17, [#allocation6], %s1832_s4, %s1832_s4, %s1831_s0  }
  0x6b   : > { %p1833_p8 = scmp.ne.s32.totalorder %s1828_s11, 0 }
  0x6c   : > { %s246_s8 = sand.u32 (!%p1833_p8), 1, %s1553_s13   ;;  %s1653_s27 = sand.u32 (!%p1833_p8), 1, %s1415_s19  }
  0x6d   : > { %244 = sbr.rel (%p1833_p8) target bundleno = 4542 (0x11be), region = 40  ;;  %s1116_s24 = sshll.u32 (!%p1833_p8), %s1653_s27, 3 }
  0x6e   : > { %s247_s28 = scalar_lea.sflag (!%p1833_p8), [#allocation3], %s246_s8  ;;  %s1656_s6 = scalar_lea.vmem (!%p1833_p8), [#allocation2], %s1116_s24 }
  0x6f   : > { %p1834_p10 = scmp.ne.s32.totalorder (!%p1833_p8), %s1825_s15, 0 }
  0x74   : > { %1394 = dma.done.wait (%p1834_p10), %s247_s28, 128  }
  0x75   : > { %1396 = vsyncadd (%p1834_p10), %s247_s28, 4294967168  ;;  %p1835_p13 = scmp.eq.s32.totalorder %s1553_s13, 0 }
  0x77   : > { %1398 = dma.done.wait (%p1835_p13), [#allocation6], 1024   ;;  %p1836_p5 = pmov %p1835_p13 }
  0x78   : > { %s1118_s11 = sshll.u32 %s1653_s27, 4 }
  0x79   : > { %1400 = vsyncadd (%p1836_p5), [#allocation6], 4294966272  ;;  %s1669_s17 = scalar_lea.vmem [#allocation7], %s1118_s11 }
  0x7a   : > { %1402 = dma.done.wait (%p1834_p10), %s247_s28, 256  }
  0x7b   : > { %1404 = vsyncadd (%p1834_p10), %s247_s28, 4294967040  ;;  %v1432_v0 = vmov 0.0   ;;  %vm1433_vm0 = vmmov 0   ;;  %v1244_v1 = vld [vmem:[#allocation5] sm:$0xff]   ;;  %v1245_v2 = vld [vmem:[#allocation5 + $0x8] sm:$0xff]   ;;  %v463_v52 = vlaneseq  ;;  %s294_s29 = scalar_lea.vmem [#allocation8], %s1118_s11 }
  0x7c   : > { %1154 = vmatprep.subr.bf16.mxu0 %v1432_v0  ;;  %1170 = vmatprep.mubr.msk.bf16.mxu0 %vm1433_vm0, %v1432_v0  ;;  %v1246_v3 = vld [vmem:[#allocation5 + $0x10] sm:$0xff]   ;;  %v1247_v4 = vld [vmem:[#allocation5 + $0x18] sm:$0xff]   ;;  %v1248_v5 = vld [vmem:[#allocation5 + $0x20] sm:$0xff]   ;;  %s1002_s16 = sshll.u32 %s294_s29, 4  ;;  %s1144_s10 = sshll.u32 %s1553_s13, 8  ;;  %s1759_s16 = int_to_ptr.vmem [resolvable:$true] %s1002_s16 }
  0x7d   : > { %1155 = vmatpush3.bf16.msra.mxu0 %v1244_v1  ;;  %v1249_v6 = vld [vmem:[#allocation5 + $0x28] sm:$0xff]   ;;  %v1250_v7 = vld [vmem:[#allocation5 + $0x30] sm:$0xff]   ;;  %v1251_v8 = vld [vmem:[#allocation5 + $0x38] sm:$0xff]   ;;  %v464_v53 = vshrl.u32 %v463_v52, 7  ;;  %s1765_s12 = scalar_lea.hbm %s1814_s5, %s1144_s10  ;;  %s989_s30 = scalar_lea.sflag [#allocation4], %s1653_s27 }
  0x7e   : > { %1156 = vmatprep.subr.bf16.mxu0 %v1432_v0  ;;  %v1252_v9 = vld [vmem:[%s1656_s6] sm:$0xff]   ;;  %s1349_s8 = scalar_lea.vmem %s1759_s16, 256  ;;  %p1837_p12 = scmp.ne.s32.totalorder %s1826_s7, 0 }
  0x7f   : > { %v412_v54 = vld [vmem:[%s1811_s2] sm:$0x1]  ;;  %v465_v55 = vsub.s32 0, %v464_v53  ;;  %p1350_p7 = scmp.ne.s32.totalorder %s1759_s16, %s1349_s8  ;;  %s1434_s13 = smov [#allocation8]  }
  0x80   : > { %v413_v59 = vld [vmem:[%s1812_s3] sm:$0x1]  ;;  %s1353_s24 = sshll.u32 %s1434_s13, 4  ;;  %s1354_s24 = int_to_ptr.vmem [resolvable:$false] %s1353_s24 }
  0x81   : > { %1157 = vmatpush3.bf16.msra.mxu0 %v1245_v2  ;;  %p1351_p2 = pnand %p1350_p7, %p1837_p12  ;;  %s1355_s28 = scalar_lea.vmem %s1354_s24, 512 }
  0x82   : > { %1158 = vmatprep.subr.bf16.mxu0 %v1432_v0  ;;  %p1356_p0 = scmp.lt.s32.totalorder %s1759_s16, %s1354_s24  ;;  %p1357_p4 = scmp.lt.s32.totalorder %s1355_s28, %s1349_s8 }
  0x83   : > { %p1352_p6 = pneg %p1351_p2 }
  0x84   : > { %p1358_p1 = por %p1357_p4, %p1356_p0 }
  0x85   : > { %1159 = vmatpush3.bf16.msra.mxu0 %v1246_v3  ;;  %v494_v3 = vand.u32 127, %v463_v52 }
  0x86   : > { %1160 = vmatprep.subr.bf16.mxu0 %v1432_v0  ;;  %p1359_p3 = pnand %p1358_p1, %p1352_p6 }
  0x87   : > { %vm495_vm1 = vcmp.lt.s32.totalorder %v494_v3, 32 }
  0x89   : > { %1161 = vmatpush3.bf16.msra.mxu0 %v1247_v4 }
  0x8a   : > { %1162 = vmatprep.subr.bf16.mxu0 %v1432_v0 }
  0x8d   : > { %1163 = vmatpush3.bf16.msra.mxu0 %v1248_v5 }
  0x8e   : > { %1164 = vmatprep.subr.bf16.mxu0 %v1432_v0 }
  0x91   : > { %1165 = vmatpush3.bf16.msra.mxu0 %v1249_v6 }
  0x92   : > { %1166 = vmatprep.subr.bf16.mxu0 %v1432_v0 }
  0x95   : > { %1167 = vmatpush3.bf16.msra.mxu0 %v1250_v7  ;;  %v489_v7 = vld [vmem:[%s1669_s17] sm:$0xff] }
  0x96   : > { %1168 = vmatprep.subr.bf16.mxu0 %v1432_v0 }
  0x99   : > { %1169 = vmatpush3.bf16.msra.mxu0 %v1251_v8 }
  0x9c   : > { %1171 = vmatmul.mubr.bf16.vlgmr.msra.gmra.mrb[0].mxu0 %v1252_v9 }
 0x16f   : > { %v405_v10 = vpop.f32.mrb[0].mxu0 }
 0x170   : > { %v414_v11 = vrot.slane %v405_v10, 4  ;;  %v429_v12 = vmul.f32 %v405_v10, %v405_v10  ;;  %v1172_v13 = vpop.f32.mrb[1].mxu0 }
 0x171   : > { %v408_v14 = vpop.f32.mrb[2].mxu0 }
 0x172   : > { %v415_v15 = vadd.f32 %v414_v11, %v405_v10  ;;  %v431_v16 = vrot.slane %v429_v12, 4  ;;  %v420_v17 = vrot.slane %v408_v14, 4  ;;  %v430_v18 = vmul.f32 %v408_v14, %v408_v14  ;;  %v1173_v19 = vpop.f32.mrb[3].mxu0 }
 0x174   : > { %v416_v20 = vrot.slane %v415_v15, 2  ;;  %v432_v21 = vadd.f32 %v431_v16, %v429_v12  ;;  %v421_v22 = vadd.f32 %v420_v17, %v408_v14  ;;  %v437_v23 = vrot.slane %v430_v18, 4  ;;  %v490_v12 = vld [vmem:[%s1669_s17 + $0x8] sm:$0xff] }
 0x176   : > { %v417_v24 = vadd.f32 %v416_v20, %v415_v15  ;;  %v433_v25 = vrot.slane %v432_v21, 2  ;;  %v422_v26 = vrot.slane %v421_v22, 2  ;;  %v438_v27 = vadd.f32 %v437_v23, %v430_v18 }
 0x178   : > { %v418_v28 = vrot.slane %v417_v24, 1  ;;  %v434_v29 = vadd.f32 %v433_v25, %v432_v21  ;;  %v423_v30 = vadd.f32 %v422_v26, %v421_v22  ;;  %v439_v31 = vrot.slane %v438_v27, 2 }
 0x17a   : > { %v419_v32 = vadd.f32 %v418_v28, %v417_v24  ;;  %v435_v33 = vrot.slane %v434_v29, 1  ;;  %v424_v34 = vrot.slane %v423_v30, 1  ;;  %v440_v35 = vadd.f32 %v439_v31, %v438_v27 }
 0x17c   : > { %v427_v36 = vmul.f32 0.125, %v419_v32  ;;  %v436_v37 = vadd.f32 %v435_v33, %v434_v29  ;;  %v425_v38 = vadd.f32 %v424_v34, %v423_v30  ;;  %v441_v39 = vrot.slane %v440_v35, 1 }
 0x17e   : > { %v443_v40 = vmul.f32 0.125, %v436_v37  ;;  %v445_v41 = vmul.f32 %v427_v36, %v427_v36  ;;  %v428_v42 = vmul.f32 0.125, %v425_v38  ;;  %v442_v43 = vadd.f32 %v441_v39, %v440_v35 }
 0x180   : > { %v447_v44 = vsub.f32 %v443_v40, %v445_v41  ;;  %v444_v45 = vmul.f32 0.125, %v442_v43  ;;  %v446_v46 = vmul.f32 %v428_v42, %v428_v42 }
 0x182   : > { %v449_v47 = vmax.f32 %v447_v44, 0.0  ;;  %v448_v48 = vsub.f32 %v444_v45, %v446_v46 }
 0x184   : > { %v451_v49 = vadd.f32 1e-05, %v449_v47  ;;  %v450_v50 = vmax.f32 %v448_v48, 0.0 }
 0x186   : > { %1253 = vrsqrt.f32 %v451_v49  ;;  %v452_v51 = vadd.f32 1e-05, %v450_v50 }
 0x188   : > { %1255 = vrsqrt.f32 %v452_v51 }
 0x190   : > { %v1254_v56 = vpop.eup %1253 }
 0x191   : > { %v455_v57 = vmul.f32 %v1254_v56, %v412_v54 }
 0x192   : > { %v1256_v58 = vpop.eup %1255 }
 0x193   : > { %v457_v60 = vmul.f32 %v455_v57, %v427_v36  ;;  %v466_v61 = vrot.slane %v455_v57, %v465_v55  ;;  %v456_v62 = vmul.f32 %v1256_v58, %v412_v54 }
 0x195   : > { %v459_v63 = vsub.f32 %v413_v59, %v457_v60  ;;  %v458_v1 = vmul.f32 %v456_v62, %v428_v42  ;;  %v470_v2 = vrot.slane %v456_v62, %v465_v55  ;;  %v473_v4 = vmul.f32 %v466_v61, %v405_v10 }
 0x197   : > { %v480_v5 = vrot.slane %v459_v63, %v465_v55  ;;  %v460_v6 = vsub.f32 %v413_v59, %v458_v1  ;;  %v474_v9 = vmul.f32 %v470_v2, %v408_v14 }
 0x199   : > { %v487_v8 = vadd.f32 %v480_v5, %v473_v4  ;;  %v484_v11 = vrot.slane %v460_v6, %v465_v55 }
 0x19b   : > { %v491_v13 = vmul.f32 %v489_v7, %v487_v8  ;;  %v488_v15 = vadd.f32 %v484_v11, %v474_v9 }
 0x19d   : > { %v1693_v16 = vsel %vm495_vm1, %v491_v13, -1e+30  ;;  %v492_v17 = vmul.f32 %v490_v12, %v488_v15 }
 0x19e   : > { %498 = vmax.xlane.f32.xlu0 %v1693_v16 }
 0x19f   : > { %v1696_v18 = vsel %vm495_vm1, %v492_v17, -1e+30 }
 0x1a2   : > { %500 = vmax.xlane.f32.xlu0 %v1696_v18 }
 0x22b   : > { %v499_v10 = vpop.xlane.xlu0 %498 }
 0x22c   : > { %v1129_v19 = vadd.f32 -1.0, %v499_v10  ;;  %v1131_v20 = vadd.f32 -0.03125, %v499_v10 }
 0x22e   : > { %v506_v21 = vadd.f32 %v1131_v20, %v1129_v19 }
 0x22f   : > { %v501_v22 = vpop.xlane.xlu0 %500 }
 0x230   : > { %v508_v14 = vmul.f32 0.5, %v506_v21  ;;  %v1130_v23 = vadd.f32 -1.0, %v501_v22  ;;  %v1132_v24 = vadd.f32 -0.03125, %v501_v22 }
 0x232   : > { %v507_v25 = vadd.f32 %v1132_v24, %v1130_v23  ;;  %v510_v26 = vsub.f32 %v1693_v16, %v508_v14 }
 0x234   : > { %v509_v27 = vmul.f32 0.5, %v507_v25  ;;  %v512_v28 = vmax.f32 %v510_v26, 0.0 }
 0x236   : > { %514 = vadd.xlane.f32.xlu1 %v512_v28  ;;  %v511_v29 = vsub.f32 %v1696_v18, %v509_v27 }
 0x238   : > { %v513_v30 = vmax.f32 %v511_v29, 0.0 }
 0x23a   : > { %516 = vadd.xlane.f32.xlu1 %v513_v30 }
 0x2c3   : > { %v515_v31 = vpop.xlane.xlu1 %514 }
 0x2c4   : > { %vm518_vm2 = vcmp.gt.f32.partialorder %v515_v31, 1.0 }
 0x2c5   : > { %v520_v32 = vsel %vm518_vm2, %v508_v14, %v1129_v19  ;;  %v522_v33 = vsel %vm518_vm2, %v1131_v20, %v508_v14 }
 0x2c6   : > { %v524_v34 = vadd.f32 %v522_v33, %v520_v32 }
 0x2c7   : > { %v517_v35 = vpop.xlane.xlu1 %516 }
 0x2c8   : > { %v526_v36 = vmul.f32 0.5, %v524_v34  ;;  %vm519_vm3 = vcmp.gt.f32.partialorder %v517_v35, 1.0 }
 0x2c9   : > { %v521_v37 = vsel %vm519_vm3, %v509_v27, %v1130_v23  ;;  %v523_v38 = vsel %vm519_vm3, %v1132_v24, %v509_v27 }
 0x2ca   : > { %v525_v39 = vadd.f32 %v523_v38, %v521_v37  ;;  %v528_v40 = vsub.f32 %v1693_v16, %v526_v36 }
 0x2cc   : > { %v527_v41 = vmul.f32 0.5, %v525_v39  ;;  %v530_v42 = vmax.f32 %v528_v40, 0.0 }
 0x2ce   : > { %532 = vadd.xlane.f32.xlu0 %v530_v42  ;;  %v529_v43 = vsub.f32 %v1696_v18, %v527_v41 }
 0x2d0   : > { %v531_v44 = vmax.f32 %v529_v43, 0.0 }
 0x2d2   : > { %534 = vadd.xlane.f32.xlu1 %v531_v44 }
 0x35b   : > { %v533_v45 = vpop.xlane.xlu0 %532 }
 0x35c   : > { %vm536_vm4 = vcmp.gt.f32.partialorder %v533_v45, 1.0 }
 0x35d   : > { %v538_v46 = vsel %vm536_vm4, %v526_v36, %v520_v32  ;;  %v540_v47 = vsel %vm536_vm4, %v522_v33, %v526_v36 }
 0x35e   : > { %v542_v48 = vadd.f32 %v540_v47, %v538_v46 }
 0x35f   : > { %v535_v49 = vpop.xlane.xlu1 %534 }
 0x360   : > { %v544_v50 = vmul.f32 0.5, %v542_v48  ;;  %vm537_vm5 = vcmp.gt.f32.partialorder %v535_v49, 1.0 }
 0x361   : > { %v539_v51 = vsel %vm537_vm5, %v527_v41, %v521_v37  ;;  %v541_v52 = vsel %vm537_vm5, %v523_v38, %v527_v41 }
 0x362   : > { %v543_v53 = vadd.f32 %v541_v52, %v539_v51  ;;  %v546_v54 = vsub.f32 %v1693_v16, %v544_v50 }
 0x364   : > { %v545_v55 = vmul.f32 0.5, %v543_v53  ;;  %v548_v56 = vmax.f32 %v546_v54, 0.0 }
 0x366   : > { %550 = vadd.xlane.f32.xlu0 %v548_v56  ;;  %v547_v57 = vsub.f32 %v1696_v18, %v545_v55 }
 0x368   : > { %v549_v58 = vmax.f32 %v547_v57, 0.0 }
 0x36a   : > { %552 = vadd.xlane.f32.xlu1 %v549_v58 }
 0x3f3   : > { %v551_v59 = vpop.xlane.xlu0 %550 }
 0x3f4   : > { %vm554_vm6 = vcmp.gt.f32.partialorder %v551_v59, 1.0 }
 0x3f5   : > { %v556_v60 = vsel %vm554_vm6, %v544_v50, %v538_v46  ;;  %v558_v61 = vsel %vm554_vm6, %v540_v47, %v544_v50 }
 0x3f6   : > { %v560_v62 = vadd.f32 %v558_v61, %v556_v60 }
 0x3f7   : > { %v553_v63 = vpop.xlane.xlu1 %552 }
 0x3f8   : > { %v562_v1 = vmul.f32 0.5, %v560_v62  ;;  %vm555_vm7 = vcmp.gt.f32.partialorder %v553_v63, 1.0 }
 0x3f9   : > { %v557_v2 = vsel %vm555_vm7, %v545_v55, %v539_v51  ;;  %v559_v3 = vsel %vm555_vm7, %v541_v52, %v545_v55 }
 0x3fa   : > { %v561_v4 = vadd.f32 %v559_v3, %v557_v2  ;;  %v564_v5 = vsub.f32 %v1693_v16, %v562_v1 }
 0x3fc   : > { %v563_v6 = vmul.f32 0.5, %v561_v4  ;;  %v566_v7 = vmax.f32 %v564_v5, 0.0 }
 0x3fe   : > { %568 = vadd.xlane.f32.xlu0 %v566_v7  ;;  %v565_v8 = vsub.f32 %v1696_v18, %v563_v6 }
 0x400   : > { %v567_v9 = vmax.f32 %v565_v8, 0.0 }
 0x402   : > { %570 = vadd.xlane.f32.xlu1 %v567_v9 }
 0x48b   : > { %v569_v11 = vpop.xlane.xlu0 %568 }
 0x48c   : > { %vm572_vm8 = vcmp.gt.f32.partialorder %v569_v11, 1.0 }
 0x48d   : > { %v574_v12 = vsel %vm572_vm8, %v562_v1, %v556_v60  ;;  %v576_v13 = vsel %vm572_vm8, %v558_v61, %v562_v1 }
 0x48e   : > { %v578_v15 = vadd.f32 %v576_v13, %v574_v12 }
 0x48f   : > { %v571_v17 = vpop.xlane.xlu1 %570 }
 0x490   : > { %v580_v10 = vmul.f32 0.5, %v578_v15  ;;  %vm573_vm9 = vcmp.gt.f32.partialorder %v571_v17, 1.0 }
 0x491   : > { %v575_v19 = vsel %vm573_vm9, %v563_v6, %v557_v2  ;;  %v577_v20 = vsel %vm573_vm9, %v559_v3, %v563_v6 }
 0x492   : > { %v579_v21 = vadd.f32 %v577_v20, %v575_v19  ;;  %v582_v22 = vsub.f32 %v1693_v16, %v580_v10 }
 0x494   : > { %v581_v14 = vmul.f32 0.5, %v579_v21  ;;  %v584_v23 = vmax.f32 %v582_v22, 0.0 }
 0x496   : > { %586 = vadd.xlane.f32.xlu0 %v584_v23  ;;  %v583_v24 = vsub.f32 %v1696_v18, %v581_v14 }
 0x498   : > { %v585_v25 = vmax.f32 %v583_v24, 0.0 }
 0x49a   : > { %588 = vadd.xlane.f32.xlu1 %v585_v25 }
 0x523   : > { %v587_v26 = vpop.xlane.xlu0 %586 }
 0x524   : > { %vm590_vm10 = vcmp.gt.f32.partialorder %v587_v26, 1.0 }
 0x525   : > { %v592_v27 = vsel %vm590_vm10, %v580_v10, %v574_v12  ;;  %v594_v28 = vsel %vm590_vm10, %v576_v13, %v580_v10 }
 0x526   : > { %v596_v29 = vadd.f32 %v594_v28, %v592_v27 }
 0x527   : > { %v589_v30 = vpop.xlane.xlu1 %588 }
 0x528   : > { %v598_v31 = vmul.f32 0.5, %v596_v29  ;;  %vm591_vm11 = vcmp.gt.f32.partialorder %v589_v30, 1.0 }
 0x529   : > { %v593_v32 = vsel %vm591_vm11, %v581_v14, %v575_v19  ;;  %v595_v33 = vsel %vm591_vm11, %v577_v20, %v581_v14 }
 0x52a   : > { %v597_v34 = vadd.f32 %v595_v33, %v593_v32  ;;  %v600_v35 = vsub.f32 %v1693_v16, %v598_v31 }
 0x52c   : > { %v599_v36 = vmul.f32 0.5, %v597_v34  ;;  %v602_v37 = vmax.f32 %v600_v35, 0.0 }
 0x52e   : > { %604 = vadd.xlane.f32.xlu0 %v602_v37  ;;  %v601_v38 = vsub.f32 %v1696_v18, %v599_v36 }
 0x530   : > { %v603_v39 = vmax.f32 %v601_v38, 0.0 }
 0x532   : > { %606 = vadd.xlane.f32.xlu1 %v603_v39 }
 0x5bb   : > { %v605_v40 = vpop.xlane.xlu0 %604 }
 0x5bc   : > { %vm608_vm12 = vcmp.gt.f32.partialorder %v605_v40, 1.0 }
 0x5bd   : > { %v610_v41 = vsel %vm608_vm12, %v598_v31, %v592_v27  ;;  %v612_v42 = vsel %vm608_vm12, %v594_v28, %v598_v31 }
 0x5be   : > { %v614_v43 = vadd.f32 %v612_v42, %v610_v41 }
 0x5bf   : > { %v607_v44 = vpop.xlane.xlu1 %606 }
 0x5c0   : > { %v616_v45 = vmul.f32 0.5, %v614_v43  ;;  %vm609_vm13 = vcmp.gt.f32.partialorder %v607_v44, 1.0 }
 0x5c1   : > { %v611_v46 = vsel %vm609_vm13, %v599_v36, %v593_v32  ;;  %v613_v47 = vsel %vm609_vm13, %v595_v33, %v599_v36 }
 0x5c2   : > { %v615_v48 = vadd.f32 %v613_v47, %v611_v46  ;;  %v618_v49 = vsub.f32 %v1693_v16, %v616_v45 }
 0x5c4   : > { %v617_v50 = vmul.f32 0.5, %v615_v48  ;;  %v620_v51 = vmax.f32 %v618_v49, 0.0 }
 0x5c6   : > { %622 = vadd.xlane.f32.xlu0 %v620_v51  ;;  %v619_v52 = vsub.f32 %v1696_v18, %v617_v50 }
 0x5c8   : > { %v621_v53 = vmax.f32 %v619_v52, 0.0 }
 0x5ca   : > { %624 = vadd.xlane.f32.xlu1 %v621_v53 }
 0x653   : > { %v623_v54 = vpop.xlane.xlu0 %622 }
 0x654   : > { %vm626_vm14 = vcmp.gt.f32.partialorder %v623_v54, 1.0 }
 0x655   : > { %v628_v55 = vsel %vm626_vm14, %v616_v45, %v610_v41  ;;  %v630_v56 = vsel %vm626_vm14, %v612_v42, %v616_v45 }
 0x656   : > { %v632_v57 = vadd.f32 %v630_v56, %v628_v55 }
 0x657   : > { %v625_v58 = vpop.xlane.xlu1 %624 }
 0x658   : > { %v634_v59 = vmul.f32 0.5, %v632_v57  ;;  %vm627_vm15 = vcmp.gt.f32.partialorder %v625_v58, 1.0 }
 0x659   : > { %v629_v60 = vsel %vm627_vm15, %v617_v50, %v611_v46  ;;  %v631_v61 = vsel %vm627_vm15, %v613_v47, %v617_v50 }
 0x65a   : > { %v633_v62 = vadd.f32 %v631_v61, %v629_v60  ;;  %v636_v63 = vsub.f32 %v1693_v16, %v634_v59 }
 0x65c   : > { %v635_v1 = vmul.f32 0.5, %v633_v62  ;;  %v638_v2 = vmax.f32 %v636_v63, 0.0 }
 0x65e   : > { %640 = vadd.xlane.f32.xlu0 %v638_v2  ;;  %v637_v3 = vsub.f32 %v1696_v18, %v635_v1 }
 0x660   : > { %v639_v4 = vmax.f32 %v637_v3, 0.0 }
 0x662   : > { %642 = vadd.xlane.f32.xlu1 %v639_v4 }
 0x6eb   : > { %v641_v5 = vpop.xlane.xlu0 %640 }
 0x6ec   : > { %vm644_vm0 = vcmp.gt.f32.partialorder %v641_v5, 1.0 }
 0x6ed   : > { %v646_v6 = vsel %vm644_vm0, %v634_v59, %v628_v55  ;;  %v648_v7 = vsel %vm644_vm0, %v630_v56, %v634_v59 }
 0x6ee   : > { %v650_v8 = vadd.f32 %v648_v7, %v646_v6 }
 0x6ef   : > { %v643_v9 = vpop.xlane.xlu1 %642 }
 0x6f0   : > { %v652_v11 = vmul.f32 0.5, %v650_v8  ;;  %vm645_vm1 = vcmp.gt.f32.partialorder %v643_v9, 1.0 }
 0x6f1   : > { %v647_v12 = vsel %vm645_vm1, %v635_v1, %v629_v60  ;;  %v649_v13 = vsel %vm645_vm1, %v631_v61, %v635_v1 }
 0x6f2   : > { %v651_v15 = vadd.f32 %v649_v13, %v647_v12  ;;  %v654_v17 = vsub.f32 %v1693_v16, %v652_v11 }
 0x6f4   : > { %v653_v10 = vmul.f32 0.5, %v651_v15  ;;  %v656_v19 = vmax.f32 %v654_v17, 0.0 }
 0x6f6   : > { %658 = vadd.xlane.f32.xlu0 %v656_v19  ;;  %v655_v20 = vsub.f32 %v1696_v18, %v653_v10 }
 0x6f8   : > { %v657_v21 = vmax.f32 %v655_v20, 0.0 }
 0x6fa   : > { %660 = vadd.xlane.f32.xlu1 %v657_v21 }
 0x783   : > { %v659_v22 = vpop.xlane.xlu0 %658 }
 0x784   : > { %vm662_vm2 = vcmp.gt.f32.partialorder %v659_v22, 1.0 }
 0x785   : > { %v664_v14 = vsel %vm662_vm2, %v652_v11, %v646_v6  ;;  %v666_v23 = vsel %vm662_vm2, %v648_v7, %v652_v11 }
 0x786   : > { %v668_v24 = vadd.f32 %v666_v23, %v664_v14 }
 0x787   : > { %v661_v25 = vpop.xlane.xlu1 %660 }
 0x788   : > { %v670_v26 = vmul.f32 0.5, %v668_v24  ;;  %vm663_vm3 = vcmp.gt.f32.partialorder %v661_v25, 1.0 }
 0x789   : > { %v665_v27 = vsel %vm663_vm3, %v653_v10, %v647_v12  ;;  %v667_v28 = vsel %vm663_vm3, %v649_v13, %v653_v10 }
 0x78a   : > { %v669_v29 = vadd.f32 %v667_v28, %v665_v27  ;;  %v672_v30 = vsub.f32 %v1693_v16, %v670_v26 }
 0x78c   : > { %v671_v31 = vmul.f32 0.5, %v669_v29  ;;  %v674_v32 = vmax.f32 %v672_v30, 0.0 }
 0x78e   : > { %676 = vadd.xlane.f32.xlu0 %v674_v32  ;;  %v673_v33 = vsub.f32 %v1696_v18, %v671_v31 }
 0x790   : > { %v675_v34 = vmax.f32 %v673_v33, 0.0 }
 0x792   : > { %678 = vadd.xlane.f32.xlu1 %v675_v34 }
 0x81b   : > { %v677_v35 = vpop.xlane.xlu0 %676 }
 0x81c   : > { %vm680_vm4 = vcmp.gt.f32.partialorder %v677_v35, 1.0 }
 0x81d   : > { %v682_v36 = vsel %vm680_vm4, %v670_v26, %v664_v14  ;;  %v684_v37 = vsel %vm680_vm4, %v666_v23, %v670_v26 }
 0x81e   : > { %v686_v38 = vadd.f32 %v684_v37, %v682_v36 }
 0x81f   : > { %v679_v39 = vpop.xlane.xlu1 %678 }
 0x820   : > { %v688_v40 = vmul.f32 0.5, %v686_v38  ;;  %vm681_vm5 = vcmp.gt.f32.partialorder %v679_v39, 1.0 }
 0x821   : > { %v683_v41 = vsel %vm681_vm5, %v671_v31, %v665_v27  ;;  %v685_v42 = vsel %vm681_vm5, %v667_v28, %v671_v31 }
 0x822   : > { %v687_v43 = vadd.f32 %v685_v42, %v683_v41  ;;  %v690_v44 = vsub.f32 %v1693_v16, %v688_v40 }
 0x824   : > { %v689_v45 = vmul.f32 0.5, %v687_v43  ;;  %v692_v46 = vmax.f32 %v690_v44, 0.0 }
 0x826   : > { %694 = vadd.xlane.f32.xlu0 %v692_v46  ;;  %v691_v47 = vsub.f32 %v1696_v18, %v689_v45 }
 0x828   : > { %v693_v48 = vmax.f32 %v691_v47, 0.0 }
 0x82a   : > { %696 = vadd.xlane.f32.xlu1 %v693_v48 }
 0x8b3   : > { %v695_v49 = vpop.xlane.xlu0 %694 }
 0x8b4   : > { %vm698_vm6 = vcmp.gt.f32.partialorder %v695_v49, 1.0 }
 0x8b5   : > { %v700_v50 = vsel %vm698_vm6, %v688_v40, %v682_v36  ;;  %v702_v51 = vsel %vm698_vm6, %v684_v37, %v688_v40 }
 0x8b6   : > { %v704_v52 = vadd.f32 %v702_v51, %v700_v50 }
 0x8b7   : > { %v697_v53 = vpop.xlane.xlu1 %696 }
 0x8b8   : > { %v706_v54 = vmul.f32 0.5, %v704_v52  ;;  %vm699_vm7 = vcmp.gt.f32.partialorder %v697_v53, 1.0 }
 0x8b9   : > { %v701_v55 = vsel %vm699_vm7, %v689_v45, %v683_v41  ;;  %v703_v56 = vsel %vm699_vm7, %v685_v42, %v689_v45 }
 0x8ba   : > { %v705_v57 = vadd.f32 %v703_v56, %v701_v55  ;;  %v708_v58 = vsub.f32 %v1693_v16, %v706_v54 }
 0x8bc   : > { %v707_v59 = vmul.f32 0.5, %v705_v57  ;;  %v710_v60 = vmax.f32 %v708_v58, 0.0 }
 0x8be   : > { %712 = vadd.xlane.f32.xlu0 %v710_v60  ;;  %v709_v61 = vsub.f32 %v1696_v18, %v707_v59 }
 0x8c0   : > { %v711_v62 = vmax.f32 %v709_v61, 0.0 }
 0x8c2   : > { %714 = vadd.xlane.f32.xlu1 %v711_v62 }
 0x94b   : > { %v713_v63 = vpop.xlane.xlu0 %712 }
 0x94c   : > { %vm716_vm8 = vcmp.gt.f32.partialorder %v713_v63, 1.0 }
 0x94d   : > { %v718_v1 = vsel %vm716_vm8, %v706_v54, %v700_v50  ;;  %v720_v2 = vsel %vm716_vm8, %v702_v51, %v706_v54 }
 0x94e   : > { %v722_v3 = vadd.f32 %v720_v2, %v718_v1 }
 0x94f   : > { %v715_v4 = vpop.xlane.xlu1 %714 }
 0x950   : > { %v724_v5 = vmul.f32 0.5, %v722_v3  ;;  %vm717_vm9 = vcmp.gt.f32.partialorder %v715_v4, 1.0 }
 0x951   : > { %v719_v6 = vsel %vm717_vm9, %v707_v59, %v701_v55  ;;  %v721_v7 = vsel %vm717_vm9, %v703_v56, %v707_v59 }
 0x952   : > { %v723_v8 = vadd.f32 %v721_v7, %v719_v6  ;;  %v726_v9 = vsub.f32 %v1693_v16, %v724_v5 }
 0x954   : > { %v725_v11 = vmul.f32 0.5, %v723_v8  ;;  %v728_v12 = vmax.f32 %v726_v9, 0.0 }
 0x956   : > { %730 = vadd.xlane.f32.xlu0 %v728_v12  ;;  %v727_v13 = vsub.f32 %v1696_v18, %v725_v11 }
 0x958   : > { %v729_v15 = vmax.f32 %v727_v13, 0.0 }
 0x95a   : > { %732 = vadd.xlane.f32.xlu1 %v729_v15 }
 0x9e3   : > { %v731_v17 = vpop.xlane.xlu0 %730 }
 0x9e4   : > { %vm734_vm10 = vcmp.gt.f32.partialorder %v731_v17, 1.0 }
 0x9e5   : > { %v736_v10 = vsel %vm734_vm10, %v724_v5, %v718_v1  ;;  %v738_v19 = vsel %vm734_vm10, %v720_v2, %v724_v5 }
 0x9e6   : > { %v740_v20 = vadd.f32 %v738_v19, %v736_v10 }
 0x9e7   : > { %v733_v21 = vpop.xlane.xlu1 %732 }
 0x9e8   : > { %v742_v22 = vmul.f32 0.5, %v740_v20  ;;  %vm735_vm11 = vcmp.gt.f32.partialorder %v733_v21, 1.0 }
 0x9e9   : > { %v737_v14 = vsel %vm735_vm11, %v725_v11, %v719_v6  ;;  %v739_v23 = vsel %vm735_vm11, %v721_v7, %v725_v11 }
 0x9ea   : > { %v741_v24 = vadd.f32 %v739_v23, %v737_v14  ;;  %v744_v25 = vsub.f32 %v1693_v16, %v742_v22 }
 0x9ec   : > { %v743_v26 = vmul.f32 0.5, %v741_v24  ;;  %v746_v27 = vmax.f32 %v744_v25, 0.0 }
 0x9ee   : > { %748 = vadd.xlane.f32.xlu0 %v746_v27  ;;  %v745_v28 = vsub.f32 %v1696_v18, %v743_v26 }
 0x9f0   : > { %v747_v29 = vmax.f32 %v745_v28, 0.0 }
 0x9f2   : > { %750 = vadd.xlane.f32.xlu1 %v747_v29 }
 0xa7b   : > { %v749_v30 = vpop.xlane.xlu0 %748 }
 0xa7c   : > { %vm752_vm12 = vcmp.gt.f32.partialorder %v749_v30, 1.0 }
 0xa7d   : > { %v754_v31 = vsel %vm752_vm12, %v742_v22, %v736_v10  ;;  %v756_v32 = vsel %vm752_vm12, %v738_v19, %v742_v22 }
 0xa7e   : > { %v758_v33 = vadd.f32 %v756_v32, %v754_v31 }
 0xa7f   : > { %v751_v34 = vpop.xlane.xlu1 %750 }
 0xa80   : > { %v760_v35 = vmul.f32 0.5, %v758_v33  ;;  %vm753_vm13 = vcmp.gt.f32.partialorder %v751_v34, 1.0 }
 0xa81   : > { %v755_v36 = vsel %vm753_vm13, %v743_v26, %v737_v14  ;;  %v757_v37 = vsel %vm753_vm13, %v739_v23, %v743_v26 }
 0xa82   : > { %v759_v38 = vadd.f32 %v757_v37, %v755_v36  ;;  %v762_v39 = vsub.f32 %v1693_v16, %v760_v35 }
 0xa84   : > { %v761_v40 = vmul.f32 0.5, %v759_v38  ;;  %v764_v41 = vmax.f32 %v762_v39, 0.0 }
 0xa86   : > { %766 = vadd.xlane.f32.xlu0 %v764_v41  ;;  %v763_v42 = vsub.f32 %v1696_v18, %v761_v40 }
 0xa88   : > { %v765_v43 = vmax.f32 %v763_v42, 0.0 }
 0xa8a   : > { %768 = vadd.xlane.f32.xlu1 %v765_v43 }
 0xb13   : > { %v767_v44 = vpop.xlane.xlu0 %766 }
 0xb14   : > { %vm770_vm14 = vcmp.gt.f32.partialorder %v767_v44, 1.0 }
 0xb15   : > { %v772_v45 = vsel %vm770_vm14, %v760_v35, %v754_v31  ;;  %v774_v46 = vsel %vm770_vm14, %v756_v32, %v760_v35 }
 0xb16   : > { %v776_v47 = vadd.f32 %v774_v46, %v772_v45 }
 0xb17   : > { %v769_v48 = vpop.xlane.xlu1 %768 }
 0xb18   : > { %v778_v49 = vmul.f32 0.5, %v776_v47  ;;  %vm771_vm15 = vcmp.gt.f32.partialorder %v769_v48, 1.0 }
 0xb19   : > { %v773_v50 = vsel %vm771_vm15, %v761_v40, %v755_v36  ;;  %v775_v51 = vsel %vm771_vm15, %v757_v37, %v761_v40 }
 0xb1a   : > { %v777_v52 = vadd.f32 %v775_v51, %v773_v50  ;;  %v780_v53 = vsub.f32 %v1693_v16, %v778_v49 }
 0xb1c   : > { %v779_v54 = vmul.f32 0.5, %v777_v52  ;;  %v782_v55 = vmax.f32 %v780_v53, 0.0 }
 0xb1e   : > { %784 = vadd.xlane.f32.xlu0 %v782_v55  ;;  %v781_v56 = vsub.f32 %v1696_v18, %v779_v54 }
 0xb20   : > { %v783_v57 = vmax.f32 %v781_v56, 0.0 }
 0xb22   : > { %786 = vadd.xlane.f32.xlu1 %v783_v57 }
 0xbab   : > { %v785_v58 = vpop.xlane.xlu0 %784 }
 0xbac   : > { %vm788_vm0 = vcmp.gt.f32.partialorder %v785_v58, 1.0 }
 0xbad   : > { %v790_v59 = vsel %vm788_vm0, %v778_v49, %v772_v45  ;;  %v792_v60 = vsel %vm788_vm0, %v774_v46, %v778_v49 }
 0xbae   : > { %v794_v61 = vadd.f32 %v792_v60, %v790_v59 }
 0xbaf   : > { %v787_v62 = vpop.xlane.xlu1 %786 }
 0xbb0   : > { %v796_v63 = vmul.f32 0.5, %v794_v61  ;;  %vm789_vm1 = vcmp.gt.f32.partialorder %v787_v62, 1.0 }
 0xbb1   : > { %v791_v1 = vsel %vm789_vm1, %v779_v54, %v773_v50  ;;  %v793_v2 = vsel %vm789_vm1, %v775_v51, %v779_v54 }
 0xbb2   : > { %v795_v3 = vadd.f32 %v793_v2, %v791_v1  ;;  %v798_v4 = vsub.f32 %v1693_v16, %v796_v63 }
 0xbb4   : > { %v797_v5 = vmul.f32 0.5, %v795_v3  ;;  %v800_v6 = vmax.f32 %v798_v4, 0.0 }
 0xbb6   : > { %802 = vadd.xlane.f32.xlu0 %v800_v6  ;;  %v799_v7 = vsub.f32 %v1696_v18, %v797_v5 }
 0xbb8   : > { %v801_v8 = vmax.f32 %v799_v7, 0.0 }
 0xbba   : > { %804 = vadd.xlane.f32.xlu1 %v801_v8 }
 0xc43   : > { %v803_v9 = vpop.xlane.xlu0 %802 }
 0xc44   : > { %vm806_vm2 = vcmp.gt.f32.partialorder %v803_v9, 1.0 }
 0xc45   : > { %v808_v11 = vsel %vm806_vm2, %v796_v63, %v790_v59  ;;  %v810_v12 = vsel %vm806_vm2, %v792_v60, %v796_v63 }
 0xc46   : > { %v812_v13 = vadd.f32 %v810_v12, %v808_v11 }
 0xc47   : > { %v805_v15 = vpop.xlane.xlu1 %804 }
 0xc48   : > { %v814_v17 = vmul.f32 0.5, %v812_v13  ;;  %vm807_vm3 = vcmp.gt.f32.partialorder %v805_v15, 1.0 }
 0xc49   : > { %v809_v10 = vsel %vm807_vm3, %v797_v5, %v791_v1  ;;  %v811_v19 = vsel %vm807_vm3, %v793_v2, %v797_v5 }
 0xc4a   : > { %v813_v20 = vadd.f32 %v811_v19, %v809_v10  ;;  %v816_v21 = vsub.f32 %v1693_v16, %v814_v17 }
 0xc4c   : > { %v815_v22 = vmul.f32 0.5, %v813_v20  ;;  %v818_v14 = vmax.f32 %v816_v21, 0.0 }
 0xc4e   : > { %820 = vadd.xlane.f32.xlu0 %v818_v14  ;;  %v817_v23 = vsub.f32 %v1696_v18, %v815_v22 }
 0xc50   : > { %v819_v24 = vmax.f32 %v817_v23, 0.0 }
 0xc52   : > { %822 = vadd.xlane.f32.xlu1 %v819_v24 }
 0xcdb   : > { %v821_v25 = vpop.xlane.xlu0 %820 }
 0xcdc   : > { %vm824_vm4 = vcmp.gt.f32.partialorder %v821_v25, 1.0 }
 0xcdd   : > { %v826_v26 = vsel %vm824_vm4, %v814_v17, %v808_v11  ;;  %v828_v27 = vsel %vm824_vm4, %v810_v12, %v814_v17 }
 0xcde   : > { %v830_v28 = vadd.f32 %v828_v27, %v826_v26 }
 0xcdf   : > { %v823_v29 = vpop.xlane.xlu1 %822 }
 0xce0   : > { %v832_v30 = vmul.f32 0.5, %v830_v28  ;;  %vm825_vm5 = vcmp.gt.f32.partialorder %v823_v29, 1.0 }
 0xce1   : > { %v827_v31 = vsel %vm825_vm5, %v815_v22, %v809_v10  ;;  %v829_v32 = vsel %vm825_vm5, %v811_v19, %v815_v22 }
 0xce2   : > { %v831_v33 = vadd.f32 %v829_v32, %v827_v31  ;;  %v834_v34 = vsub.f32 %v1693_v16, %v832_v30 }
 0xce4   : > { %v833_v35 = vmul.f32 0.5, %v831_v33  ;;  %v836_v36 = vmax.f32 %v834_v34, 0.0 }
 0xce6   : > { %838 = vadd.xlane.f32.xlu0 %v836_v36  ;;  %v835_v37 = vsub.f32 %v1696_v18, %v833_v35 }
 0xce8   : > { %v837_v38 = vmax.f32 %v835_v37, 0.0 }
 0xcea   : > { %840 = vadd.xlane.f32.xlu1 %v837_v38 }
 0xd73   : > { %v839_v39 = vpop.xlane.xlu0 %838 }
 0xd74   : > { %vm842_vm6 = vcmp.gt.f32.partialorder %v839_v39, 1.0 }
 0xd75   : > { %v844_v40 = vsel %vm842_vm6, %v832_v30, %v826_v26  ;;  %v846_v41 = vsel %vm842_vm6, %v828_v27, %v832_v30 }
 0xd76   : > { %v848_v42 = vadd.f32 %v846_v41, %v844_v40 }
 0xd77   : > { %v841_v43 = vpop.xlane.xlu1 %840 }
 0xd78   : > { %v850_v44 = vmul.f32 0.5, %v848_v42  ;;  %vm843_vm7 = vcmp.gt.f32.partialorder %v841_v43, 1.0 }
 0xd79   : > { %v845_v45 = vsel %vm843_vm7, %v833_v35, %v827_v31  ;;  %v847_v46 = vsel %vm843_vm7, %v829_v32, %v833_v35 }
 0xd7a   : > { %v849_v47 = vadd.f32 %v847_v46, %v845_v45  ;;  %v852_v48 = vsub.f32 %v1693_v16, %v850_v44 }
 0xd7c   : > { %v851_v49 = vmul.f32 0.5, %v849_v47  ;;  %v854_v50 = vmax.f32 %v852_v48, 0.0 }
 0xd7e   : > { %856 = vadd.xlane.f32.xlu0 %v854_v50  ;;  %v853_v51 = vsub.f32 %v1696_v18, %v851_v49 }
 0xd80   : > { %v855_v52 = vmax.f32 %v853_v51, 0.0 }
 0xd82   : > { %858 = vadd.xlane.f32.xlu1 %v855_v52 }
 0xe0b   : > { %v857_v53 = vpop.xlane.xlu0 %856 }
 0xe0c   : > { %vm860_vm8 = vcmp.gt.f32.partialorder %v857_v53, 1.0 }
 0xe0d   : > { %v862_v54 = vsel %vm860_vm8, %v850_v44, %v844_v40  ;;  %v864_v55 = vsel %vm860_vm8, %v846_v41, %v850_v44 }
 0xe0e   : > { %v866_v56 = vadd.f32 %v864_v55, %v862_v54 }
 0xe0f   : > { %v859_v57 = vpop.xlane.xlu1 %858 }
 0xe10   : > { %v868_v58 = vmul.f32 0.5, %v866_v56  ;;  %vm861_vm9 = vcmp.gt.f32.partialorder %v859_v57, 1.0 }
 0xe11   : > { %v863_v59 = vsel %vm861_vm9, %v851_v49, %v845_v45  ;;  %v865_v60 = vsel %vm861_vm9, %v847_v46, %v851_v49 }
 0xe12   : > { %v867_v61 = vadd.f32 %v865_v60, %v863_v59  ;;  %v870_v62 = vsub.f32 %v1693_v16, %v868_v58 }
 0xe14   : > { %v869_v63 = vmul.f32 0.5, %v867_v61  ;;  %v872_v1 = vmax.f32 %v870_v62, 0.0 }
 0xe16   : > { %874 = vadd.xlane.f32.xlu0 %v872_v1  ;;  %v871_v2 = vsub.f32 %v1696_v18, %v869_v63 }
 0xe18   : > { %v873_v3 = vmax.f32 %v871_v2, 0.0 }
 0xe1a   : > { %876 = vadd.xlane.f32.xlu1 %v873_v3 }
 0xea3   : > { %v875_v4 = vpop.xlane.xlu0 %874 }
 0xea4   : > { %vm878_vm10 = vcmp.gt.f32.partialorder %v875_v4, 1.0 }
 0xea5   : > { %v880_v5 = vsel %vm878_vm10, %v868_v58, %v862_v54  ;;  %v882_v6 = vsel %vm878_vm10, %v864_v55, %v868_v58 }
 0xea6   : > { %v884_v7 = vadd.f32 %v882_v6, %v880_v5 }
 0xea7   : > { %v877_v8 = vpop.xlane.xlu1 %876 }
 0xea8   : > { %v886_v9 = vmul.f32 0.5, %v884_v7  ;;  %vm879_vm11 = vcmp.gt.f32.partialorder %v877_v8, 1.0 }
 0xea9   : > { %v881_v11 = vsel %vm879_vm11, %v869_v63, %v863_v59  ;;  %v883_v12 = vsel %vm879_vm11, %v865_v60, %v869_v63 }
 0xeaa   : > { %v885_v13 = vadd.f32 %v883_v12, %v881_v11  ;;  %v888_v15 = vsub.f32 %v1693_v16, %v886_v9 }
 0xeac   : > { %v887_v17 = vmul.f32 0.5, %v885_v13  ;;  %v890_v10 = vmax.f32 %v888_v15, 0.0 }
 0xeae   : > { %892 = vadd.xlane.f32.xlu0 %v890_v10  ;;  %v889_v19 = vsub.f32 %v1696_v18, %v887_v17 }
 0xeb0   : > { %v891_v20 = vmax.f32 %v889_v19, 0.0 }
 0xeb2   : > { %894 = vadd.xlane.f32.xlu1 %v891_v20 }
 0xf3b   : > { %v893_v21 = vpop.xlane.xlu0 %892 }
 0xf3c   : > { %vm896_vm12 = vcmp.gt.f32.partialorder %v893_v21, 1.0 }
 0xf3d   : > { %v898_v22 = vsel %vm896_vm12, %v886_v9, %v880_v5  ;;  %v900_v14 = vsel %vm896_vm12, %v882_v6, %v886_v9 }
 0xf3e   : > { %v902_v23 = vadd.f32 %v900_v14, %v898_v22 }
 0xf3f   : > { %v895_v24 = vpop.xlane.xlu1 %894 }
 0xf40   : > { %v904_v25 = vmul.f32 0.5, %v902_v23  ;;  %vm897_vm13 = vcmp.gt.f32.partialorder %v895_v24, 1.0 }
 0xf41   : > { %v899_v26 = vsel %vm897_vm13, %v887_v17, %v881_v11  ;;  %v901_v27 = vsel %vm897_vm13, %v883_v12, %v887_v17 }
 0xf42   : > { %v903_v28 = vadd.f32 %v901_v27, %v899_v26  ;;  %v906_v29 = vsub.f32 %v1693_v16, %v904_v25 }
 0xf44   : > { %v905_v30 = vmul.f32 0.5, %v903_v28  ;;  %v908_v31 = vmax.f32 %v906_v29, 0.0 }
 0xf46   : > { %910 = vadd.xlane.f32.xlu0 %v908_v31  ;;  %v907_v32 = vsub.f32 %v1696_v18, %v905_v30 }
 0xf48   : > { %v909_v33 = vmax.f32 %v907_v32, 0.0 }
 0xf4a   : > { %912 = vadd.xlane.f32.xlu1 %v909_v33 }
 0xfd3   : > { %v911_v34 = vpop.xlane.xlu0 %910 }
 0xfd4   : > { %vm914_vm14 = vcmp.gt.f32.partialorder %v911_v34, 1.0 }
 0xfd5   : > { %v916_v35 = vsel %vm914_vm14, %v904_v25, %v898_v22  ;;  %v918_v36 = vsel %vm914_vm14, %v900_v14, %v904_v25 }
 0xfd6   : > { %v920_v37 = vadd.f32 %v918_v36, %v916_v35 }
 0xfd7   : > { %v913_v38 = vpop.xlane.xlu1 %912 }
 0xfd8   : > { %v922_v39 = vmul.f32 0.5, %v920_v37  ;;  %vm915_vm15 = vcmp.gt.f32.partialorder %v913_v38, 1.0 }
 0xfd9   : > { %v917_v40 = vsel %vm915_vm15, %v905_v30, %v899_v26  ;;  %v919_v41 = vsel %vm915_vm15, %v901_v27, %v905_v30 }
 0xfda   : > { %v921_v42 = vadd.f32 %v919_v41, %v917_v40  ;;  %v924_v43 = vsub.f32 %v1693_v16, %v922_v39 }
 0xfdc   : > { %v923_v44 = vmul.f32 0.5, %v921_v42  ;;  %v926_v45 = vmax.f32 %v924_v43, 0.0 }
 0xfde   : > { %928 = vadd.xlane.f32.xlu0 %v926_v45  ;;  %v925_v46 = vsub.f32 %v1696_v18, %v923_v44 }
 0xfe0   : > { %v927_v47 = vmax.f32 %v925_v46, 0.0 }
 0xfe2   : > { %930 = vadd.xlane.f32.xlu1 %v927_v47 }
0x106b   : > { %v929_v48 = vpop.xlane.xlu0 %928 }
0x106c   : > { %vm932_vm0 = vcmp.gt.f32.partialorder %v929_v48, 1.0 }
0x106d   : > { %v934_v49 = vsel %vm932_vm0, %v922_v39, %v916_v35  ;;  %v936_v50 = vsel %vm932_vm0, %v918_v36, %v922_v39 }
0x106e   : > { %v938_v51 = vadd.f32 %v936_v50, %v934_v49 }
0x106f   : > { %v931_v52 = vpop.xlane.xlu1 %930 }
0x1070   : > { %v940_v53 = vmul.f32 0.5, %v938_v51  ;;  %vm933_vm1 = vcmp.gt.f32.partialorder %v931_v52, 1.0 }
0x1071   : > { %v935_v54 = vsel %vm933_vm1, %v923_v44, %v917_v40  ;;  %v937_v55 = vsel %vm933_vm1, %v919_v41, %v923_v44 }
0x1072   : > { %v939_v56 = vadd.f32 %v937_v55, %v935_v54  ;;  %v942_v57 = vsub.f32 %v1693_v16, %v940_v53 }
0x1074   : > { %v941_v58 = vmul.f32 0.5, %v939_v56  ;;  %v944_v59 = vmax.f32 %v942_v57, 0.0 }
0x1076   : > { %946 = vadd.xlane.f32.xlu0 %v944_v59  ;;  %v943_v60 = vsub.f32 %v1696_v18, %v941_v58 }
0x1078   : > { %v945_v61 = vmax.f32 %v943_v60, 0.0 }
0x107a   : > { %948 = vadd.xlane.f32.xlu1 %v945_v61 }
0x1103   : > { %v947_v62 = vpop.xlane.xlu0 %946 }
0x1104   : > { %vm950_vm2 = vcmp.gt.f32.partialorder %v947_v62, 1.0 }
0x1105   : > { %v952_v63 = vsel %vm950_vm2, %v940_v53, %v934_v49  ;;  %v954_v1 = vsel %vm950_vm2, %v936_v50, %v940_v53 }
0x1106   : > { %v956_v2 = vadd.f32 %v954_v1, %v952_v63 }
0x1107   : > { %v949_v3 = vpop.xlane.xlu1 %948 }
0x1108   : > { %vm951_vm3 = vcmp.gt.f32.partialorder %v949_v3, 1.0  ;;  %v958_v4 = vmul.f32 0.5, %v956_v2 }
0x1109   : > { %v953_v5 = vsel %vm951_vm3, %v941_v58, %v935_v54  ;;  %v955_v6 = vsel %vm951_vm3, %v937_v55, %v941_v58 }
0x110a   : > { %v957_v7 = vadd.f32 %v955_v6, %v953_v5  ;;  %vm960_vm4 = vcmp.gt.f32.partialorder %v1693_v16, %v958_v4 }
0x110b   : > { %v1133_v8 = vsel %vm960_vm4, 1.0, %v1432_v0 }
0x110c   : > { %966 = vadd.xlane.f32.xlu0 %v1133_v8  ;;  %v959_v9 = vmul.f32 0.5, %v957_v7  ;;  %v970_v11 = vmul.f32 %v1133_v8, %v1693_v16 }
0x110e   : > { %vm961_vm5 = vcmp.gt.f32.partialorder %v1696_v18, %v959_v9 }
0x110f   : > { %v1134_v12 = vsel %vm961_vm5, 1.0, %v1432_v0 }
0x1110   : > { %968 = vadd.xlane.f32.xlu1 %v1134_v12  ;;  %972 = vadd.xlane.f32.xlu0 %v970_v11  ;;  %v971_v13 = vmul.f32 %v1134_v12, %v1696_v18 }
0x1114   : > { %974 = vadd.xlane.f32.xlu1 %v971_v13 }
0x1199   : > { %v967_v15 = vpop.xlane.xlu0 %966 }
0x119a   : > { %1257 = vrcp.f32 %v967_v15 }
0x119d   : > { %v969_v17 = vpop.xlane.xlu1 %968  ;;  %v973_v10 = vpop.xlane.xlu0 %972 }
0x119e   : > { %1259 = vrcp.f32 %v969_v17  ;;  %v1135_v19 = vadd.f32 -1.0, %v973_v10 }
0x11a1   : > { %v975_v21 = vpop.xlane.xlu1 %974 }
0x11a2   : > { %v1136_v0 = vadd.f32 -1.0, %v975_v21 }
0x11a4   : > { %v1258_v20 = vpop.eup %1257 }
0x11a5   : > { %v979_v22 = vmul.f32 %v1258_v20, %v1135_v19 }
0x11a7   : > { %v982_v14 = vsub.f32 %v1693_v16, %v979_v22 }
0x11a8   : > { %v1260_v23 = vpop.eup %1259 }
0x11a9   : > { %v984_v24 = vmax.f32 %v982_v14, 0.0  ;;  %v981_v25 = vmul.f32 %v1260_v23, %v1136_v0 }
0x11ab   : > { %986 = vst [vmem:[%s294_s29] sm:$0xff] %v984_v24  ;;  %v983_v26 = vsub.f32 %v1696_v18, %v981_v25 }
0x11ad   : > { %v985_v16 = vmax.f32 %v983_v26, 0.0 }
0x11af   : > { %987 = vst [vmem:[%s294_s29 + $0x8] sm:$0xff] %v985_v16 }
0x11b0   : > { %1362 = shalt.err (!%p1359_p3)
}
0x11b1   : > { %s1363_s6 = scalar_lea.hbm %s1765_s12, 256  ;;  %s1367_s15 = scalar_lea.hbm %s1814_s5, 512 }
0x11b2   : > { %p1364_p11 = scmp.ne.s32.totalorder %s1765_s12, %s1363_s6  ;;  %p1368_p10 = scmp.lt.u32.totalorder %s1765_s12, %s1814_s5 }
0x11b3   : > { %p1369_p13 = scmp.lt.u32.totalorder %s1367_s15, %s1363_s6  ;;  %p1371_p7 = scmp.lt.u32.totalorder %s1363_s6, %s1765_s12 }
0x11b4   : > { %p1365_p9 = pnand %p1364_p11, %p1837_p12 }
0x11b5   : > { %p1370_p5 = por %p1369_p13, %p1368_p10 }
0x11b6   : > { %p1366_p8 = pneg %p1365_p9 }
0x11b7   : > { %p1372_p2 = por %p1371_p7, %p1370_p5 }
0x11b9   : > { %p1373_p6 = pnand %p1372_p2, %p1366_p8 }
0x11bb   : > { %1376 = shalt.err (!%p1373_p6)
}
0x11bc   : > { %s1435_s14 = smov 128   ;;  %s1436_s29 = smov 8  }
0x11bd   : > { %1182 = dma.vmem_to_hbm [thread:$0]  (%p1837_p12), %s1759_s16, 256, %s1765_s12, %s989_s30, %s1435_s14, %s1435_s14, %s1436_s29  }
0x11be PF: > { %s1017_s10 = sand.u32 1, %s1411_s18   ;;  %p1838_p0 = scmp.ne.s32.totalorder %s1827_s9, 0 }
0x11bf   : > { %p1839_p4 = scmp.ge.s32.totalorder %s1423_s21, 2  ;;  %s1018_s0 = scalar_lea.sflag [#allocation4], %s1017_s10 }
0x11c1   : > { %p1196_p1 = pnand %p1839_p4, %p1838_p0 }
0x11c3   : > { %1406 = dma.done.wait (!%p1196_p1), %s1018_s0, 256  }
0x11c4   : > { %1408 = vsyncadd (!%p1196_p1), %s1018_s0, 4294967040  ;;  %p19_p3 = scmp.ge.s32.totalorder %s1488_s22, 4   ;;  %s1840_s18 = smov %s1415_s19 }
0x11c5   : > { %s1841_s19 = smov %s1419_s20  ;;  %s1842_s20 = smov %s1497_s25 }
0x11c6   : > { %s1843_s21 = smov %s1488_s22  ;;  %21 = sbr.rel (!%p19_p3) target bundleno = 9 (0x9), region = 100 }
0x11cd   :  { %1023 = vsyncpa [#allocation3], 1 }
0x11ce   :  { %1025 = vsyncpa [#allocation3 + $0x1], 1 }
0x11cf   :  { %1026 = vsyncpa [#allocation6], 1 }
0x11d0   :  { %1027 = vsyncpa [#allocation4], 1 }
0x11d1   :  { %1029 = vsyncpa [#allocation4 + $0x1], 1 }

</bundles_post_ra>
